<compile_context>
chip_gen: v7x
topology: tpu7x:2x2x1
jax: 0.10.0
libtpu: 0.0.40
codegen_flags: <defaults>
</compile_context>

<pallas_src>
import jax
import jax.numpy as jnp
from jax import lax
from jax.experimental import pallas as pl
from jax.experimental.pallas import tpu as pltpu

EPS = 1e-5
MXU_DTYPE = jnp.bfloat16   # MXU inputs; accumulation / stats / affines stay f32
STAT_ROWS = 8              # sublane-aligned rows for the partial-stat outputs


def _vmem_limit(block_bytes):
    """Scoped-VMEM limit from the real per-step footprint (double-buffered
    blocks + margin).  Grows toward ~100 MiB only when tiles need it (v5e/v6e
    have 128 MiB); at real sizes clamp lower (~48 MiB) for v7x's 64 MiB/TC."""
    return int(min(100 * 2**20, max(8 * 2**20, 6 * block_bytes)))


def _row_tile(m, cap=1024):
    """Largest sublane-aligned row tile <= cap that divides m."""
    if m <= cap:
        return m
    for t in range(cap, 7, -8):
        if m % t == 0:
            return t
    return m


# ----------------------------- Pallas kernels ------------------------------ #

def _make_conv1_kernel(Do, Ho, Wo, Cin):
    Ms = Do * Ho * Wo
    K = 8 * Cin

    def kernel(xf_ref, w1_ref, wb_ref, bb_ref,
               h1_ref, byp_ref, mu_ref, m2_ref):
        # ---- conv1 as 8 parity-tap matmuls (K = 8*Cin), f32 accumulation ----
        acc = jnp.zeros((Ms, Cin), jnp.float32)
        t = 0
        for qd in range(2):
            for qh in range(2):
                for qw in range(2):
                    slab = xf_ref[0, qd:qd + Do, qh:qh + Ho, qw:qw + Wo, :]
                    acc = acc + jnp.dot(slab.reshape(Ms, K), w1_ref[t],
                                        preferred_element_type=jnp.float32)
                    t += 1
        h1_ref[0] = acc.reshape(Do, Ho, Wo, Cin)

        # ---- per-sample BN1 partials (mean + centred M2, Welford-style) -----
        mu = jnp.sum(acc, axis=0, keepdims=True) * (1.0 / Ms)
        m2 = jnp.sum((acc - mu) * (acc - mu), axis=0, keepdims=True)
        mu_ref[...] = jnp.broadcast_to(mu, (STAT_ROWS, Cin))
        m2_ref[...] = jnp.broadcast_to(m2, (STAT_ROWS, Cin))

        # ---- bypass: AvgPool3d(2,2)(x) recovered from the parity fold -------
        # original window offset a maps to fold depth d+a, parity 1-a (etc.)
        pool = jnp.zeros((Do, Ho, Wo, Cin), jnp.float32)
        for a in range(2):
            for b in range(2):
                for e in range(2):
                    coff = ((1 - a) * 4 + (1 - b) * 2 + (1 - e)) * Cin
                    pool = pool + xf_ref[0, a:a + Do, b:b + Ho, e:e + Wo,
                                         coff:coff + Cin].astype(jnp.float32)
        pool = pool.reshape(Ms, Cin) * 0.125
        byp_ref[...] = jnp.dot(pool, wb_ref[...],
                               preferred_element_type=jnp.float32) + bb_ref[...]

    return kernel


def _make_conv2_kernel(Do, Ho, Wo, Cin, Cout):
    Ms = Do * Ho * Wo

    def kernel(h1_ref, sc_ref, sh_ref, w2_ref,
               h2_ref, mu_ref, m2_ref, vol_ref):
        # fused BN1 affine + ReLU, applied BEFORE zero padding so the conv2
        # halo stays exactly zero; padded activated volume lives only in VMEM.
        a = jnp.maximum(h1_ref[0] * sc_ref[...] + sh_ref[...], 0.0)
        vol_ref[...] = jnp.zeros(vol_ref.shape, vol_ref.dtype)
        vol_ref[1:1 + Do, 1:1 + Ho, 1:1 + Wo, :] = a.astype(vol_ref.dtype)

        # ---- conv2 as 27 tap matmuls over the VMEM volume -------------------
        acc = jnp.zeros((Ms, Cout), jnp.float32)
        t = 0
        for kd in range(3):
            for kh in range(3):
                for kw in range(3):
                    slab = vol_ref[kd:kd + Do, kh:kh + Ho, kw:kw + Wo, :]
                    acc = acc + jnp.dot(slab.reshape(Ms, Cin), w2_ref[t],
                                        preferred_element_type=jnp.float32)
                    t += 1
        h2_ref[...] = acc

        mu = jnp.sum(acc, axis=0, keepdims=True) * (1.0 / Ms)
        m2 = jnp.sum((acc - mu) * (acc - mu), axis=0, keepdims=True)
        mu_ref[...] = jnp.broadcast_to(mu, (STAT_ROWS, Cout))
        m2_ref[...] = jnp.broadcast_to(m2, (STAT_ROWS, Cout))

    return kernel


def _epilogue_kernel(h2_ref, byp_ref, sc_ref, sh_ref, o_ref):
    o_ref[...] = jnp.maximum(
        byp_ref[...] + h2_ref[...] * sc_ref[...] + sh_ref[...], 0.0)


# ----------------------------- Pallas wrappers ----------------------------- #

def conv1_bypass_pass(xf, w1_taps, wb, bb, Do, Ho, Wo):
    N = xf.shape[0]
    Cin = w1_taps.shape[2]
    Cout = wb.shape[1]
    Ms = Do * Ho * Wo
    kernel = _make_conv1_kernel(Do, Ho, Wo, Cin)
    blk = (xf[0].size * xf.dtype.itemsize
           + w1_taps.size * w1_taps.dtype.itemsize
           + Ms * Cin * 4 + Ms * Cout * 4 + wb.size * 4 + bb.size * 4)
    return pl.pallas_call(
        kernel,
        out_shape=(jax.ShapeDtypeStruct((N, Do, Ho, Wo, Cin), jnp.float32),
                   jax.ShapeDtypeStruct((N * Ms, Cout), jnp.float32),
                   jax.ShapeDtypeStruct((N * STAT_ROWS, Cin), jnp.float32),
                   jax.ShapeDtypeStruct((N * STAT_ROWS, Cin), jnp.float32)),
        grid_spec=pltpu.PrefetchScalarGridSpec(
            num_scalar_prefetch=0, grid=(N,),
            in_specs=[
                pl.BlockSpec((1, Do + 1, Ho + 1, Wo + 1, 8 * Cin),
                             lambda n: (n, 0, 0, 0, 0)),
                pl.BlockSpec((8, 8 * Cin, Cin), lambda n: (0, 0, 0)),
                pl.BlockSpec((Cin, Cout), lambda n: (0, 0)),
                pl.BlockSpec((1, Cout), lambda n: (0, 0)),
            ],
            out_specs=(
                pl.BlockSpec((1, Do, Ho, Wo, Cin), lambda n: (n, 0, 0, 0, 0)),
                pl.BlockSpec((Ms, Cout), lambda n: (n, 0)),
                pl.BlockSpec((STAT_ROWS, Cin), lambda n: (n, 0)),
                pl.BlockSpec((STAT_ROWS, Cin), lambda n: (n, 0)),
            )),
        compiler_params=pltpu.CompilerParams(
            dimension_semantics=("parallel",),      # megacore-shardable (v7x)
            vmem_limit_bytes=_vmem_limit(blk)),
    )(xf, w1_taps, wb, bb)


def conv2_pass(h1, scale1, shift1, w2_taps):
    N, Do, Ho, Wo, Cin = h1.shape
    Cout = w2_taps.shape[2]
    Ms = Do * Ho * Wo
    kernel = _make_conv2_kernel(Do, Ho, Wo, Cin, Cout)
    vol_elems = (Do + 2) * (Ho + 2) * (Wo + 2) * Cin
    blk = (Ms * Cin * 4 + w2_taps.size * w2_taps.dtype.itemsize
           + Ms * Cout * 4 + vol_elems * jnp.dtype(MXU_DTYPE).itemsize)
    return pl.pallas_call(
        kernel,
        out_shape=(jax.ShapeDtypeStruct((N * Ms, Cout), jnp.float32),
                   jax.ShapeDtypeStruct((N * STAT_ROWS, Cout), jnp.float32),
                   jax.ShapeDtypeStruct((N * STAT_ROWS, Cout), jnp.float32)),
        grid_spec=pltpu.PrefetchScalarGridSpec(
            num_scalar_prefetch=0, grid=(N,),
            in_specs=[
                pl.BlockSpec((1, Do, Ho, Wo, Cin), lambda n: (n, 0, 0, 0, 0)),
                pl.BlockSpec((1, Cin), lambda n: (0, 0)),
                pl.BlockSpec((1, Cin), lambda n: (0, 0)),
                pl.BlockSpec((27, Cin, Cout), lambda n: (0, 0, 0)),
            ],
            out_specs=(
                pl.BlockSpec((Ms, Cout), lambda n: (n, 0)),
                pl.BlockSpec((STAT_ROWS, Cout), lambda n: (n, 0)),
                pl.BlockSpec((STAT_ROWS, Cout), lambda n: (n, 0)),
            ),
            scratch_shapes=[
                pltpu.VMEM((Do + 2, Ho + 2, Wo + 2, Cin), MXU_DTYPE)]),
        compiler_params=pltpu.CompilerParams(
            dimension_semantics=("parallel",),
            vmem_limit_bytes=_vmem_limit(blk)),
    )(h1, scale1, shift1, w2_taps)


def fused_epilogue(h2, byp, scale2, shift2):
    """out = ReLU(byp + h2*scale2 + shift2) on a lane-dense (rows, 128) view."""
    M, C = h2.shape
    if (M * C) % 128 == 0 and 128 % C == 0:
        lanes, rows = 128, (M * C) // 128
        h2v, bypv = h2.reshape(rows, lanes), byp.reshape(rows, lanes)
        scv = jnp.tile(scale2, (1, lanes // C))
        shv = jnp.tile(shift2, (1, lanes // C))
    else:  # fallback for channel counts that don't tile 128 lanes
        lanes, rows = C, M
        h2v, bypv, scv, shv = h2, byp, scale2, shift2
    tm = _row_tile(rows)
    blk = tm * lanes * 4 * 3 + lanes * 8
    out = pl.pallas_call(
        _epilogue_kernel,
        out_shape=jax.ShapeDtypeStruct((rows, lanes), jnp.float32),
        grid_spec=pltpu.PrefetchScalarGridSpec(
            num_scalar_prefetch=0, grid=(rows // tm,),
            in_specs=[pl.BlockSpec((tm, lanes), lambda i: (i, 0)),
                      pl.BlockSpec((tm, lanes), lambda i: (i, 0)),
                      pl.BlockSpec((1, lanes), lambda i: (0, 0)),
                      pl.BlockSpec((1, lanes), lambda i: (0, 0))],
            out_specs=pl.BlockSpec((tm, lanes), lambda i: (i, 0))),
        compiler_params=pltpu.CompilerParams(
            dimension_semantics=("parallel",),
            vmem_limit_bytes=_vmem_limit(blk)),
    )(h2v, bypv, scv, shv)
    return out.reshape(M, C)


# --------------------------------- glue ------------------------------------ #

def _parity_fold(x_cl):
    """Zero-pad by 1 and fold the 2x2x2 parity into channels:
    (N, D, H, W, C) -> (N, D/2+1, H/2+1, W/2+1, 8*C), channel order (rd,rh,rw,c).
    Turns the k=4 / stride-2 / pad-1 conv into a k=2 / stride-1 valid conv."""
    N, D, H, W, C = x_cl.shape
    xp = jnp.pad(x_cl, ((0, 0), (1, 1), (1, 1), (1, 1), (0, 0)))
    f = xp.reshape(N, D // 2 + 1, 2, H // 2 + 1, 2, W // 2 + 1, 2, C)
    f = f.transpose(0, 1, 3, 5, 2, 4, 6, 7)
    return f.reshape(N, D // 2 + 1, H // 2 + 1, W // 2 + 1, 8 * C)


def _fold_w1(w1):
    """(Cout, Cin, 4, 4, 4) OIDHW -> (8 taps (qd,qh,qw), 8*Cin (rd,rh,rw,ci), Cout)."""
    co, ci = w1.shape[0], w1.shape[1]
    w = w1.transpose(2, 3, 4, 1, 0)               # (kD, kH, kW, Ci, Co)
    w = w.reshape(2, 2, 2, 2, 2, 2, ci, co)       # (qd, rd, qh, rh, qw, rw, Ci, Co)
    w = w.transpose(0, 2, 4, 1, 3, 5, 6, 7)       # (qd, qh, qw, rd, rh, rw, Ci, Co)
    return w.reshape(8, 8 * ci, co)


def _taps_w2(w2):
    """(Cout, Cin, 3, 3, 3) OIDHW -> (27 taps (kd,kh,kw), Cin, Cout)."""
    co, ci = w2.shape[0], w2.shape[1]
    return w2.transpose(2, 3, 4, 1, 0).reshape(27, ci, co)


def _combine_stats(mean_p, m2_p, rows_per_block):
    """Exact parallel (Chan/Welford) combination of equal-sized partials."""
    nb = mean_p.shape[0]
    mean = jnp.mean(mean_p, axis=0)
    m2 = jnp.sum(m2_p, axis=0) + rows_per_block * jnp.sum(
        (mean_p - mean[None, :]) ** 2, axis=0)
    var = m2 / (nb * rows_per_block)
    return mean, var


def _bn_affine(mean, var, gamma, beta):
    scale = gamma / jnp.sqrt(var + EPS)
    shift = beta - mean * scale
    return (scale.reshape(1, -1).astype(jnp.float32),
            shift.reshape(1, -1).astype(jnp.float32))


def spectral_normalize(w, n_iter=50):
    """Divide conv weight by its top singular value (viewed as (Cout, -1))."""
    wm = w.reshape(w.shape[0], -1).astype(jnp.float32)
    u = jnp.ones((wm.shape[0],), jnp.float32) / jnp.sqrt(wm.shape[0])
    for _ in range(n_iter):
        v = wm.T @ u
        v = v / (jnp.linalg.norm(v) + 1e-12)
        u = wm @ v
        u = u / (jnp.linalg.norm(u) + 1e-12)
    sigma = u @ (wm @ v)
    return (w / sigma).astype(jnp.float32)


def down_layer_residual(x, p):
    """Pallas implementation of DownLayerResidual.forward (NCDHW in/out)."""
    N, Cin, D, H, W = x.shape
    Cout = p['w_byp'].shape[0]
    assert D % 2 == 0 and H % 2 == 0 and W % 2 == 0
    Do, Ho, Wo = D // 2, H // 2, W // 2
    Ms = Do * Ho * Wo

    # channels-last + bf16 once at the boundary, BEFORE any data rearrangement
    x_cl = x.transpose(0, 2, 3, 4, 1).astype(MXU_DTYPE)
    xf = _parity_fold(x_cl)                                    # (N,Do+1,Ho+1,Wo+1,8Cin)

    # spectrally-normalized weights -> per-tap matrices, bf16 cast once here.
    # b1/b2 dropped (exactly cancelled by the batch-stat BN mean subtraction).
    w1_taps = _fold_w1(p['w1']).astype(MXU_DTYPE)              # (8, 8Cin, Cin)
    w2_taps = _taps_w2(p['w2']).astype(MXU_DTYPE)              # (27, Cin, Cout)
    wb = p['w_byp'].reshape(Cout, Cin).T.astype(jnp.float32)   # (Cin, Cout)
    bb = p['b_byp'].reshape(1, Cout).astype(jnp.float32)

    # pass A: conv1 + BN1 partial stats + fused bypass (pool + 1x1 conv + bias)
    h1, byp, mu1_p, m21_p = conv1_bypass_pass(xf, w1_taps, wb, bb, Do, Ho, Wo)
    mean1, var1 = _combine_stats(mu1_p.reshape(N, STAT_ROWS, Cin)[:, 0, :],
                                 m21_p.reshape(N, STAT_ROWS, Cin)[:, 0, :], Ms)
    scale1, shift1 = _bn_affine(mean1, var1, p['gamma1'], p['beta1'])

    # pass B: fused BN1 affine + ReLU + conv2 + BN2 partial stats
    h2, mu2_p, m22_p = conv2_pass(h1, scale1, shift1, w2_taps)
    mean2, var2 = _combine_stats(mu2_p.reshape(N, STAT_ROWS, Cout)[:, 0, :],
                                 m22_p.reshape(N, STAT_ROWS, Cout)[:, 0, :], Ms)
    scale2, shift2 = _bn_affine(mean2, var2, p['gamma2'], p['beta2'])

    # pass C: lane-dense epilogue  ReLU(byp + h2*scale2 + shift2)
    out = fused_epilogue(h2, byp, scale2, shift2)              # (N*Ms, Cout)
    return out.reshape(N, Do, Ho, Wo, Cout).transpose(0, 4, 1, 2, 3)


# ------------------------- pure-JAX reference check ------------------------ #

def ref_forward(x, p):
    dn = ('NCDHW', 'OIDHW', 'NCDHW')

    def conv(y, w, b, stride, pad):
        z = lax.conv_general_dilated(y, w, (stride,) * 3, [(pad, pad)] * 3,
                                     dimension_numbers=dn)
        return z + b.reshape(1, -1, 1, 1, 1)

    def bn(y, g, beta):
        m = y.mean(axis=(0, 2, 3, 4), keepdims=True)
        v = ((y - m) ** 2).mean(axis=(0, 2, 3, 4), keepdims=True)
        return ((y - m) / jnp.sqrt(v + EPS) * g.reshape(1, -1, 1, 1, 1)
                + beta.reshape(1, -1, 1, 1, 1))

    N, C, D, H, W = x.shape
    pool = x.reshape(N, C, D // 2, 2, H // 2, 2, W // 2, 2).mean(axis=(3, 5, 7))
    byp = conv(pool, p['w_byp'], p['b_byp'], 1, 0)
    r = conv(x, p['w1'], p['b1'], 2, 1)          # reference keeps the biases
    r = jnp.maximum(bn(r, p['gamma1'], p['beta1']), 0.0)
    r = conv(r, p['w2'], p['b2'], 1, 1)
    r = bn(r, p['gamma2'], p['beta2'])
    return jnp.maximum(byp + r, 0.0)


# ----------------------------------- main ----------------------------------- #

if __name__ == "__main__":
    key = jax.random.PRNGKey(0)
    N, Cin, Cout, S = 2, 4, 8, 8        # input x: (2, 4, 8, 8, 8) NCDHW
    ks = jax.random.split(key, 11)

    x = jax.random.normal(ks[0], (N, Cin, S, S, S), jnp.float32)
    params = {
        'w_byp': spectral_normalize(
            0.1 * jax.random.normal(ks[1], (Cout, Cin, 1, 1, 1), jnp.float32)),
        'b_byp': 0.1 * jax.random.normal(ks[2], (Cout,), jnp.float32),
        'w1': spectral_normalize(
            0.1 * jax.random.normal(ks[3], (Cin, Cin, 4, 4, 4), jnp.float32)),
        'b1': 0.1 * jax.random.normal(ks[4], (Cin,), jnp.float32),
        'gamma1': 1.0 + 0.1 * jax.random.normal(ks[5], (Cin,), jnp.float32),
        'beta1': 0.1 * jax.random.normal(ks[6], (Cin,), jnp.float32),
        'w2': spectral_normalize(
            0.1 * jax.random.normal(ks[7], (Cout, Cin, 3, 3, 3), jnp.float32)),
        'b2': 0.1 * jax.random.normal(ks[8], (Cout,), jnp.float32),
        'gamma2': 1.0 + 0.1 * jax.random.normal(ks[9], (Cout,), jnp.float32),
        'beta2': 0.1 * jax.random.normal(ks[10], (Cout,), jnp.float32),
    }

    out = jax.block_until_ready(down_layer_residual(x, params))
    assert out.shape == (N, Cout, S // 2, S // 2, S // 2), out.shape

    ref = ref_forward(x, params)
    err = float(jnp.max(jnp.abs(out - ref)))
    # bf16 MXU inputs (x / tap weights) deviate from the all-f32 reference by
    # up to ~1e-2 after the two BatchNorm re-scalings at these magnitudes;
    # with MXU_DTYPE=f32 the same pipeline matches to <1e-2.
    tol = 1e-2 if jnp.dtype(MXU_DTYPE) == jnp.dtype(jnp.float32) else 3e-2
    assert err < tol, f"max abs err {err}"

    print("KERNEL_OK")
</pallas_src>

<mosaic_0001>
module attributes {stable_mosaic.version = 11 : i64} {
  func.func @kernel(%arg0: i32, %arg1: memref<1x5x5x5x32xbf16, #tpu.memory_space<vmem>>, %arg2: memref<8x32x4xbf16, #tpu.memory_space<vmem>>, %arg3: memref<4x8xf32, #tpu.memory_space<vmem>>, %arg4: memref<1x8xf32, #tpu.memory_space<vmem>>, %arg5: memref<1x4x4x4x4xf32, #tpu.memory_space<vmem>>, %arg6: memref<64x8xf32, #tpu.memory_space<vmem>>, %arg7: memref<8x4xf32, #tpu.memory_space<vmem>>, %arg8: memref<8x4xf32, #tpu.memory_space<vmem>>) attributes {dimension_semantics = [#tpu.dimension_semantics<parallel>], iteration_bounds = array<i64: 2>, scalar_prefetch = 0 : i64, scratch_operands = 0 : i64, tpu.core_type = #tpu.core_type<tc>, window_params = [{transform_indices = @transform_0, window_bounds = array<i64: 1, 5, 5, 5, 32>}, {pipeline_mode = #tpu.pipeline_mode<synchronous>, transform_indices = @transform_1, window_bounds = array<i64: 8, 32, 4>}, {pipeline_mode = #tpu.pipeline_mode<synchronous>, transform_indices = @transform_2, window_bounds = array<i64: 4, 8>}, {pipeline_mode = #tpu.pipeline_mode<synchronous>, transform_indices = @transform_3, window_bounds = array<i64: 1, 8>}, {transform_indices = @transform_4, window_bounds = array<i64: 1, 4, 4, 4, 4>}, {transform_indices = @transform_5, window_bounds = array<i64: 64, 8>}, {transform_indices = @transform_6, window_bounds = array<i64: 8, 4>}, {transform_indices = @transform_7, window_bounds = array<i64: 8, 4>}]} {
    %cst = arith.constant 0.000000e+00 : f32
    %0 = vector.broadcast %cst : f32 to vector<64x4xf32>
    %c0 = arith.constant 0 : index
    %c0_0 = arith.constant 0 : index
    %c0_1 = arith.constant 0 : index
    %c0_2 = arith.constant 0 : index
    %c0_3 = arith.constant 0 : index
    %1 = vector.load %arg1[%c0, %c0_0, %c0_1, %c0_2, %c0_3] : memref<1x5x5x5x32xbf16, #tpu.memory_space<vmem>>, vector<1x4x4x4x32xbf16>
    %2 = vector.shape_cast %1 : vector<1x4x4x4x32xbf16> to vector<4x4x4x32xbf16>
    %3 = vector.shape_cast %2 : vector<4x4x4x32xbf16> to vector<64x32xbf16>
    %c0_4 = arith.constant 0 : index
    %c0_5 = arith.constant 0 : index
    %c0_6 = arith.constant 0 : index
    %4 = vector.load %arg2[%c0_4, %c0_5, %c0_6] : memref<8x32x4xbf16, #tpu.memory_space<vmem>>, vector<1x32x4xbf16>
    %5 = vector.shape_cast %4 : vector<1x32x4xbf16> to vector<32x4xbf16>
    %cst_7 = arith.constant dense<0.000000e+00> : vector<64x4xf32>
    %6 = tpu.matmul %3, %5, %cst_7 {dimension_numbers = #tpu.dot_dimension_numbers<[1], [0], [0], [1], [0, 0, 1, 1], [], []>} : vector<64x32xbf16>, vector<32x4xbf16>, vector<64x4xf32> -> vector<64x4xf32>
    %7 = arith.addf %0, %6 : vector<64x4xf32>
    %c0_8 = arith.constant 0 : index
    %c0_9 = arith.constant 0 : index
    %c0_10 = arith.constant 0 : index
    %c1 = arith.constant 1 : index
    %c0_11 = arith.constant 0 : index
    %8 = vector.load %arg1[%c0_8, %c0_9, %c0_10, %c1, %c0_11] : memref<1x5x5x5x32xbf16, #tpu.memory_space<vmem>>, vector<1x4x4x4x32xbf16>
    %9 = vector.shape_cast %8 : vector<1x4x4x4x32xbf16> to vector<4x4x4x32xbf16>
    %10 = vector.shape_cast %9 : vector<4x4x4x32xbf16> to vector<64x32xbf16>
    %c1_12 = arith.constant 1 : index
    %c0_13 = arith.constant 0 : index
    %c0_14 = arith.constant 0 : index
    %11 = vector.load %arg2[%c1_12, %c0_13, %c0_14] : memref<8x32x4xbf16, #tpu.memory_space<vmem>>, vector<1x32x4xbf16>
    %12 = vector.shape_cast %11 : vector<1x32x4xbf16> to vector<32x4xbf16>
    %cst_15 = arith.constant dense<0.000000e+00> : vector<64x4xf32>
    %13 = tpu.matmul %10, %12, %cst_15 {dimension_numbers = #tpu.dot_dimension_numbers<[1], [0], [0], [1], [0, 0, 1, 1], [], []>} : vector<64x32xbf16>, vector<32x4xbf16>, vector<64x4xf32> -> vector<64x4xf32>
    %14 = arith.addf %7, %13 : vector<64x4xf32>
    %c0_16 = arith.constant 0 : index
    %c0_17 = arith.constant 0 : index
    %c1_18 = arith.constant 1 : index
    %c0_19 = arith.constant 0 : index
    %c0_20 = arith.constant 0 : index
    %15 = vector.load %arg1[%c0_16, %c0_17, %c1_18, %c0_19, %c0_20] : memref<1x5x5x5x32xbf16, #tpu.memory_space<vmem>>, vector<1x4x4x4x32xbf16>
    %16 = vector.shape_cast %15 : vector<1x4x4x4x32xbf16> to vector<4x4x4x32xbf16>
    %17 = vector.shape_cast %16 : vector<4x4x4x32xbf16> to vector<64x32xbf16>
    %c2 = arith.constant 2 : index
    %c0_21 = arith.constant 0 : index
    %c0_22 = arith.constant 0 : index
    %18 = vector.load %arg2[%c2, %c0_21, %c0_22] : memref<8x32x4xbf16, #tpu.memory_space<vmem>>, vector<1x32x4xbf16>
    %19 = vector.shape_cast %18 : vector<1x32x4xbf16> to vector<32x4xbf16>
    %cst_23 = arith.constant dense<0.000000e+00> : vector<64x4xf32>
    %20 = tpu.matmul %17, %19, %cst_23 {dimension_numbers = #tpu.dot_dimension_numbers<[1], [0], [0], [1], [0, 0, 1, 1], [], []>} : vector<64x32xbf16>, vector<32x4xbf16>, vector<64x4xf32> -> vector<64x4xf32>
    %21 = arith.addf %14, %20 : vector<64x4xf32>
    %c0_24 = arith.constant 0 : index
    %c0_25 = arith.constant 0 : index
    %c1_26 = arith.constant 1 : index
    %c1_27 = arith.constant 1 : index
    %c0_28 = arith.constant 0 : index
    %22 = vector.load %arg1[%c0_24, %c0_25, %c1_26, %c1_27, %c0_28] : memref<1x5x5x5x32xbf16, #tpu.memory_space<vmem>>, vector<1x4x4x4x32xbf16>
    %23 = vector.shape_cast %22 : vector<1x4x4x4x32xbf16> to vector<4x4x4x32xbf16>
    %24 = vector.shape_cast %23 : vector<4x4x4x32xbf16> to vector<64x32xbf16>
    %c3 = arith.constant 3 : index
    %c0_29 = arith.constant 0 : index
    %c0_30 = arith.constant 0 : index
    %25 = vector.load %arg2[%c3, %c0_29, %c0_30] : memref<8x32x4xbf16, #tpu.memory_space<vmem>>, vector<1x32x4xbf16>
    %26 = vector.shape_cast %25 : vector<1x32x4xbf16> to vector<32x4xbf16>
    %cst_31 = arith.constant dense<0.000000e+00> : vector<64x4xf32>
    %27 = tpu.matmul %24, %26, %cst_31 {dimension_numbers = #tpu.dot_dimension_numbers<[1], [0], [0], [1], [0, 0, 1, 1], [], []>} : vector<64x32xbf16>, vector<32x4xbf16>, vector<64x4xf32> -> vector<64x4xf32>
    %28 = arith.addf %21, %27 : vector<64x4xf32>
    %c0_32 = arith.constant 0 : index
    %c1_33 = arith.constant 1 : index
    %c0_34 = arith.constant 0 : index
    %c0_35 = arith.constant 0 : index
    %c0_36 = arith.constant 0 : index
    %29 = vector.load %arg1[%c0_32, %c1_33, %c0_34, %c0_35, %c0_36] : memref<1x5x5x5x32xbf16, #tpu.memory_space<vmem>>, vector<1x4x4x4x32xbf16>
    %30 = vector.shape_cast %29 : vector<1x4x4x4x32xbf16> to vector<4x4x4x32xbf16>
    %31 = vector.shape_cast %30 : vector<4x4x4x32xbf16> to vector<64x32xbf16>
    %c4 = arith.constant 4 : index
    %c0_37 = arith.constant 0 : index
    %c0_38 = arith.constant 0 : index
    %32 = vector.load %arg2[%c4, %c0_37, %c0_38] : memref<8x32x4xbf16, #tpu.memory_space<vmem>>, vector<1x32x4xbf16>
    %33 = vector.shape_cast %32 : vector<1x32x4xbf16> to vector<32x4xbf16>
    %cst_39 = arith.constant dense<0.000000e+00> : vector<64x4xf32>
    %34 = tpu.matmul %31, %33, %cst_39 {dimension_numbers = #tpu.dot_dimension_numbers<[1], [0], [0], [1], [0, 0, 1, 1], [], []>} : vector<64x32xbf16>, vector<32x4xbf16>, vector<64x4xf32> -> vector<64x4xf32>
    %35 = arith.addf %28, %34 : vector<64x4xf32>
    %c0_40 = arith.constant 0 : index
    %c1_41 = arith.constant 1 : index
    %c0_42 = arith.constant 0 : index
    %c1_43 = arith.constant 1 : index
    %c0_44 = arith.constant 0 : index
    %36 = vector.load %arg1[%c0_40, %c1_41, %c0_42, %c1_43, %c0_44] : memref<1x5x5x5x32xbf16, #tpu.memory_space<vmem>>, vector<1x4x4x4x32xbf16>
    %37 = vector.shape_cast %36 : vector<1x4x4x4x32xbf16> to vector<4x4x4x32xbf16>
    %38 = vector.shape_cast %37 : vector<4x4x4x32xbf16> to vector<64x32xbf16>
    %c5 = arith.constant 5 : index
    %c0_45 = arith.constant 0 : index
    %c0_46 = arith.constant 0 : index
    %39 = vector.load %arg2[%c5, %c0_45, %c0_46] : memref<8x32x4xbf16, #tpu.memory_space<vmem>>, vector<1x32x4xbf16>
    %40 = vector.shape_cast %39 : vector<1x32x4xbf16> to vector<32x4xbf16>
    %cst_47 = arith.constant dense<0.000000e+00> : vector<64x4xf32>
    %41 = tpu.matmul %38, %40, %cst_47 {dimension_numbers = #tpu.dot_dimension_numbers<[1], [0], [0], [1], [0, 0, 1, 1], [], []>} : vector<64x32xbf16>, vector<32x4xbf16>, vector<64x4xf32> -> vector<64x4xf32>
    %42 = arith.addf %35, %41 : vector<64x4xf32>
    %c0_48 = arith.constant 0 : index
    %c1_49 = arith.constant 1 : index
    %c1_50 = arith.constant 1 : index
    %c0_51 = arith.constant 0 : index
    %c0_52 = arith.constant 0 : index
    %43 = vector.load %arg1[%c0_48, %c1_49, %c1_50, %c0_51, %c0_52] : memref<1x5x5x5x32xbf16, #tpu.memory_space<vmem>>, vector<1x4x4x4x32xbf16>
    %44 = vector.shape_cast %43 : vector<1x4x4x4x32xbf16> to vector<4x4x4x32xbf16>
    %45 = vector.shape_cast %44 : vector<4x4x4x32xbf16> to vector<64x32xbf16>
    %c6 = arith.constant 6 : index
    %c0_53 = arith.constant 0 : index
    %c0_54 = arith.constant 0 : index
    %46 = vector.load %arg2[%c6, %c0_53, %c0_54] : memref<8x32x4xbf16, #tpu.memory_space<vmem>>, vector<1x32x4xbf16>
    %47 = vector.shape_cast %46 : vector<1x32x4xbf16> to vector<32x4xbf16>
    %cst_55 = arith.constant dense<0.000000e+00> : vector<64x4xf32>
    %48 = tpu.matmul %45, %47, %cst_55 {dimension_numbers = #tpu.dot_dimension_numbers<[1], [0], [0], [1], [0, 0, 1, 1], [], []>} : vector<64x32xbf16>, vector<32x4xbf16>, vector<64x4xf32> -> vector<64x4xf32>
    %49 = arith.addf %42, %48 : vector<64x4xf32>
    %c0_56 = arith.constant 0 : index
    %c1_57 = arith.constant 1 : index
    %c1_58 = arith.constant 1 : index
    %c1_59 = arith.constant 1 : index
    %c0_60 = arith.constant 0 : index
    %50 = vector.load %arg1[%c0_56, %c1_57, %c1_58, %c1_59, %c0_60] : memref<1x5x5x5x32xbf16, #tpu.memory_space<vmem>>, vector<1x4x4x4x32xbf16>
    %51 = vector.shape_cast %50 : vector<1x4x4x4x32xbf16> to vector<4x4x4x32xbf16>
    %52 = vector.shape_cast %51 : vector<4x4x4x32xbf16> to vector<64x32xbf16>
    %c7 = arith.constant 7 : index
    %c0_61 = arith.constant 0 : index
    %c0_62 = arith.constant 0 : index
    %53 = vector.load %arg2[%c7, %c0_61, %c0_62] : memref<8x32x4xbf16, #tpu.memory_space<vmem>>, vector<1x32x4xbf16>
    %54 = vector.shape_cast %53 : vector<1x32x4xbf16> to vector<32x4xbf16>
    %cst_63 = arith.constant dense<0.000000e+00> : vector<64x4xf32>
    %55 = tpu.matmul %52, %54, %cst_63 {dimension_numbers = #tpu.dot_dimension_numbers<[1], [0], [0], [1], [0, 0, 1, 1], [], []>} : vector<64x32xbf16>, vector<32x4xbf16>, vector<64x4xf32> -> vector<64x4xf32>
    %56 = arith.addf %49, %55 : vector<64x4xf32>
    %57 = vector.shape_cast %56 : vector<64x4xf32> to vector<4x4x4x4xf32>
    %c0_64 = arith.constant 0 : index
    %c0_65 = arith.constant 0 : index
    %c0_66 = arith.constant 0 : index
    %c0_67 = arith.constant 0 : index
    %c0_68 = arith.constant 0 : index
    %58 = vector.load %arg5[%c0_64, %c0_65, %c0_66, %c0_67, %c0_68] : memref<1x4x4x4x4xf32, #tpu.memory_space<vmem>>, vector<1x4x4x4x4xf32>
    %59 = vector.shape_cast %58 : vector<1x4x4x4x4xf32> to vector<4x4x4x4xf32>
    %60 = vector.shape_cast %57 : vector<4x4x4x4xf32> to vector<1x4x4x4x4xf32>
    tpu.vector_store %arg5[%c0_64, %c0_65, %c0_66, %c0_67, %c0_68], %60 {strides = array<i32>} : memref<1x4x4x4x4xf32, #tpu.memory_space<vmem>>, vector<1x4x4x4x4xf32>,
    %cst_69 = arith.constant dense<0.000000e+00> : vector<4xf32>
    %61 = vector.multi_reduction <add>, %56, %cst_69 [0] : vector<64x4xf32> to vector<4xf32>
    %62 = vector.shape_cast %61 : vector<4xf32> to vector<1x4xf32>
    %cst_70 = arith.constant 1.562500e-02 : f32
    %63 = vector.broadcast %cst_70 : f32 to vector<1x4xf32>
    %64 = arith.mulf %62, %63 : vector<1x4xf32>
    %65 = vector.broadcast %64 : vector<1x4xf32> to vector<64x4xf32>
    %66 = arith.subf %56, %65 : vector<64x4xf32>
    %67 = vector.broadcast %64 : vector<1x4xf32> to vector<64x4xf32>
    %68 = arith.subf %56, %67 : vector<64x4xf32>
    %69 = arith.mulf %66, %68 : vector<64x4xf32>
    %cst_71 = arith.constant dense<0.000000e+00> : vector<4xf32>
    %70 = vector.multi_reduction <add>, %69, %cst_71 [0] : vector<64x4xf32> to vector<4xf32>
    %71 = vector.shape_cast %70 : vector<4xf32> to vector<1x4xf32>
    %72 = vector.shape_cast %64 : vector<1x4xf32> to vector<1x4xf32>
    %73 = vector.broadcast %72 : vector<1x4xf32> to vector<8x4xf32>
    %c0_72 = arith.constant 0 : index
    %c0_73 = arith.constant 0 : index
    %74 = vector.load %arg7[%c0_72, %c0_73] : memref<8x4xf32, #tpu.memory_space<vmem>>, vector<8x4xf32>
    tpu.vector_store %arg7[%c0_72, %c0_73], %73 {strides = array<i32>} : memref<8x4xf32, #tpu.memory_space<vmem>>, vector<8x4xf32>,
    %75 = vector.shape_cast %71 : vector<1x4xf32> to vector<1x4xf32>
    %76 = vector.broadcast %75 : vector<1x4xf32> to vector<8x4xf32>
    %c0_74 = arith.constant 0 : index
    %c0_75 = arith.constant 0 : index
    %77 = vector.load %arg8[%c0_74, %c0_75] : memref<8x4xf32, #tpu.memory_space<vmem>>, vector<8x4xf32>
    tpu.vector_store %arg8[%c0_74, %c0_75], %76 {strides = array<i32>} : memref<8x4xf32, #tpu.memory_space<vmem>>, vector<8x4xf32>,
    %cst_76 = arith.constant 0.000000e+00 : f32
    %78 = vector.broadcast %cst_76 : f32 to vector<4x4x4x4xf32>
    %c0_77 = arith.constant 0 : index
    %c0_78 = arith.constant 0 : index
    %c0_79 = arith.constant 0 : index
    %c0_80 = arith.constant 0 : index
    %c28 = arith.constant 28 : index
    %79 = vector.load %arg1[%c0_77, %c0_78, %c0_79, %c0_80, %c28] : memref<1x5x5x5x32xbf16, #tpu.memory_space<vmem>>, vector<1x4x4x4x4xbf16>
    %80 = vector.shape_cast %79 : vector<1x4x4x4x4xbf16> to vector<4x4x4x4xbf16>
    %81 = arith.extf %80 : vector<4x4x4x4xbf16> to vector<4x4x4x4xf32>
    %82 = arith.addf %78, %81 : vector<4x4x4x4xf32>
    %c0_81 = arith.constant 0 : index
    %c0_82 = arith.constant 0 : index
    %c0_83 = arith.constant 0 : index
    %c1_84 = arith.constant 1 : index
    %c24 = arith.constant 24 : index
    %83 = vector.load %arg1[%c0_81, %c0_82, %c0_83, %c1_84, %c24] : memref<1x5x5x5x32xbf16, #tpu.memory_space<vmem>>, vector<1x4x4x4x4xbf16>
    %84 = vector.shape_cast %83 : vector<1x4x4x4x4xbf16> to vector<4x4x4x4xbf16>
    %85 = arith.extf %84 : vector<4x4x4x4xbf16> to vector<4x4x4x4xf32>
    %86 = arith.addf %82, %85 : vector<4x4x4x4xf32>
    %c0_85 = arith.constant 0 : index
    %c0_86 = arith.constant 0 : index
    %c1_87 = arith.constant 1 : index
    %c0_88 = arith.constant 0 : index
    %c20 = arith.constant 20 : index
    %87 = vector.load %arg1[%c0_85, %c0_86, %c1_87, %c0_88, %c20] : memref<1x5x5x5x32xbf16, #tpu.memory_space<vmem>>, vector<1x4x4x4x4xbf16>
    %88 = vector.shape_cast %87 : vector<1x4x4x4x4xbf16> to vector<4x4x4x4xbf16>
    %89 = arith.extf %88 : vector<4x4x4x4xbf16> to vector<4x4x4x4xf32>
    %90 = arith.addf %86, %89 : vector<4x4x4x4xf32>
    %c0_89 = arith.constant 0 : index
    %c0_90 = arith.constant 0 : index
    %c1_91 = arith.constant 1 : index
    %c1_92 = arith.constant 1 : index
    %c16 = arith.constant 16 : index
    %91 = vector.load %arg1[%c0_89, %c0_90, %c1_91, %c1_92, %c16] : memref<1x5x5x5x32xbf16, #tpu.memory_space<vmem>>, vector<1x4x4x4x4xbf16>
    %92 = vector.shape_cast %91 : vector<1x4x4x4x4xbf16> to vector<4x4x4x4xbf16>
    %93 = arith.extf %92 : vector<4x4x4x4xbf16> to vector<4x4x4x4xf32>
    %94 = arith.addf %90, %93 : vector<4x4x4x4xf32>
    %c0_93 = arith.constant 0 : index
    %c1_94 = arith.constant 1 : index
    %c0_95 = arith.constant 0 : index
    %c0_96 = arith.constant 0 : index
    %c12 = arith.constant 12 : index
    %95 = vector.load %arg1[%c0_93, %c1_94, %c0_95, %c0_96, %c12] : memref<1x5x5x5x32xbf16, #tpu.memory_space<vmem>>, vector<1x4x4x4x4xbf16>
    %96 = vector.shape_cast %95 : vector<1x4x4x4x4xbf16> to vector<4x4x4x4xbf16>
    %97 = arith.extf %96 : vector<4x4x4x4xbf16> to vector<4x4x4x4xf32>
    %98 = arith.addf %94, %97 : vector<4x4x4x4xf32>
    %c0_97 = arith.constant 0 : index
    %c1_98 = arith.constant 1 : index
    %c0_99 = arith.constant 0 : index
    %c1_100 = arith.constant 1 : index
    %c8 = arith.constant 8 : index
    %99 = vector.load %arg1[%c0_97, %c1_98, %c0_99, %c1_100, %c8] : memref<1x5x5x5x32xbf16, #tpu.memory_space<vmem>>, vector<1x4x4x4x4xbf16>
    %100 = vector.shape_cast %99 : vector<1x4x4x4x4xbf16> to vector<4x4x4x4xbf16>
    %101 = arith.extf %100 : vector<4x4x4x4xbf16> to vector<4x4x4x4xf32>
    %102 = arith.addf %98, %101 : vector<4x4x4x4xf32>
    %c0_101 = arith.constant 0 : index
    %c1_102 = arith.constant 1 : index
    %c1_103 = arith.constant 1 : index
    %c0_104 = arith.constant 0 : index
    %c4_105 = arith.constant 4 : index
    %103 = vector.load %arg1[%c0_101, %c1_102, %c1_103, %c0_104, %c4_105] : memref<1x5x5x5x32xbf16, #tpu.memory_space<vmem>>, vector<1x4x4x4x4xbf16>
    %104 = vector.shape_cast %103 : vector<1x4x4x4x4xbf16> to vector<4x4x4x4xbf16>
    %105 = arith.extf %104 : vector<4x4x4x4xbf16> to vector<4x4x4x4xf32>
    %106 = arith.addf %102, %105 : vector<4x4x4x4xf32>
    %c0_106 = arith.constant 0 : index
    %c1_107 = arith.constant 1 : index
    %c1_108 = arith.constant 1 : index
    %c1_109 = arith.constant 1 : index
    %c0_110 = arith.constant 0 : index
    %107 = vector.load %arg1[%c0_106, %c1_107, %c1_108, %c1_109, %c0_110] : memref<1x5x5x5x32xbf16, #tpu.memory_space<vmem>>, vector<1x4x4x4x4xbf16>
    %108 = vector.shape_cast %107 : vector<1x4x4x4x4xbf16> to vector<4x4x4x4xbf16>
    %109 = arith.extf %108 : vector<4x4x4x4xbf16> to vector<4x4x4x4xf32>
    %110 = arith.addf %106, %109 : vector<4x4x4x4xf32>
    %111 = vector.shape_cast %110 : vector<4x4x4x4xf32> to vector<64x4xf32>
    %cst_111 = arith.constant 1.250000e-01 : f32
    %112 = vector.broadcast %cst_111 : f32 to vector<64x4xf32>
    %113 = arith.mulf %111, %112 : vector<64x4xf32>
    %c0_112 = arith.constant 0 : index
    %c0_113 = arith.constant 0 : index
    %114 = vector.load %arg3[%c0_112, %c0_113] : memref<4x8xf32, #tpu.memory_space<vmem>>, vector<4x8xf32>
    %cst_114 = arith.constant dense<0.000000e+00> : vector<64x8xf32>
    %115 = tpu.matmul %113, %114, %cst_114 {dimension_numbers = #tpu.dot_dimension_numbers<[1], [0], [0], [1], [0, 0, 1, 1], [], []>} : vector<64x4xf32>, vector<4x8xf32>, vector<64x8xf32> -> vector<64x8xf32>
    %c0_115 = arith.constant 0 : index
    %c0_116 = arith.constant 0 : index
    %116 = vector.load %arg4[%c0_115, %c0_116] : memref<1x8xf32, #tpu.memory_space<vmem>>, vector<1x8xf32>
    %117 = vector.broadcast %116 : vector<1x8xf32> to vector<64x8xf32>
    %118 = arith.addf %115, %117 : vector<64x8xf32>
    %c0_117 = arith.constant 0 : index
    %c0_118 = arith.constant 0 : index
    %119 = vector.load %arg6[%c0_117, %c0_118] : memref<64x8xf32, #tpu.memory_space<vmem>>, vector<64x8xf32>
    tpu.vector_store %arg6[%c0_117, %c0_118], %118 {strides = array<i32>} : memref<64x8xf32, #tpu.memory_space<vmem>>, vector<64x8xf32>,
    return
  }
  func.func @transform_0(%arg0: i32) -> (i32, i32, i32, i32, i32) {
    %c0_i32 = arith.constant 0 : i32
    %c0_i32_0 = arith.constant 0 : i32
    %c0_i32_1 = arith.constant 0 : i32
    %c0_i32_2 = arith.constant 0 : i32
    %c0_i32_3 = arith.constant 0 : i32
    return %arg0, %c0_i32, %c0_i32_0, %c0_i32_1, %c0_i32_2 : i32, i32, i32, i32, i32
  }
  func.func @transform_1(%arg0: i32) -> (i32, i32, i32) {
    %c0_i32 = arith.constant 0 : i32
    %c0_i32_0 = arith.constant 0 : i32
    %c0_i32_1 = arith.constant 0 : i32
    %c0_i32_2 = arith.constant 0 : i32
    return %c0_i32, %c0_i32_0, %c0_i32_1 : i32, i32, i32
  }
  func.func @transform_2(%arg0: i32) -> (i32, i32) {
    %c0_i32 = arith.constant 0 : i32
    %c0_i32_0 = arith.constant 0 : i32
    %c0_i32_1 = arith.constant 0 : i32
    return %c0_i32, %c0_i32_0 : i32, i32
  }
  func.func @transform_3(%arg0: i32) -> (i32, i32) {
    %c0_i32 = arith.constant 0 : i32
    %c0_i32_0 = arith.constant 0 : i32
    %c0_i32_1 = arith.constant 0 : i32
    return %c0_i32, %c0_i32_0 : i32, i32
  }
  func.func @transform_4(%arg0: i32) -> (i32, i32, i32, i32, i32) {
    %c0_i32 = arith.constant 0 : i32
    %c0_i32_0 = arith.constant 0 : i32
    %c0_i32_1 = arith.constant 0 : i32
    %c0_i32_2 = arith.constant 0 : i32
    %c0_i32_3 = arith.constant 0 : i32
    return %arg0, %c0_i32, %c0_i32_0, %c0_i32_1, %c0_i32_2 : i32, i32, i32, i32, i32
  }
  func.func @transform_5(%arg0: i32) -> (i32, i32) {
    %c0_i32 = arith.constant 0 : i32
    %c0_i32_0 = arith.constant 0 : i32
    return %arg0, %c0_i32 : i32, i32
  }
  func.func @transform_6(%arg0: i32) -> (i32, i32) {
    %c0_i32 = arith.constant 0 : i32
    %c0_i32_0 = arith.constant 0 : i32
    return %arg0, %c0_i32 : i32, i32
  }
  func.func @transform_7(%arg0: i32) -> (i32, i32) {
    %c0_i32 = arith.constant 0 : i32
    %c0_i32_0 = arith.constant 0 : i32
    return %arg0, %c0_i32 : i32, i32
  }
}

</mosaic_0001>

<bundles_post_ra>
// kernel: tpu_custom_call.1
= control target key start
LH: loop header
LB: loop body
LE: loop exit
PB: predicated region body
PF: predicated region fallthrough
CT: control target
= control target key end

     0   :  { %13 = vsyncpa [#allocation3], 0  ;;  %s7401_s0 = inlined_call_operand.vmem [shape: bf16[2,5,5,5,32], index: 0, kind: input, shape index: {}]   ;;  %s7402_s1 = inlined_call_operand.vmem [shape: bf16[8,32,4], index: 1, kind: input, shape index: {}]   ;;  %s7403_s2 = inlined_call_operand.vmem [shape: f32[4,8], index: 2, kind: input, shape index: {}]   ;;  %s7404_s3 = inlined_call_operand.vmem [shape: f32[1,8], index: 3, kind: input, shape index: {}]   ;;  %s7405_s4 = inlined_call_operand.hbm [shape: f32[2,4,4,4,4], index: 4, kind: output, shape index: {0}]   ;;  %s7406_s5 = inlined_call_operand.vmem [shape: f32[128,8], index: 5, kind: output, shape index: {1}]   ;;  %s7407_s6 = inlined_call_operand.vmem [shape: f32[16,4], index: 6, kind: output, shape index: {2}]   ;;  %s7408_s7 = inlined_call_operand.vmem [shape: f32[16,4], index: 7, kind: output, shape index: {3}]  }
   0x1   :  { %15 = vsyncpa [#allocation3 + $0x1], 0  ;;  %s5924_s24 = smov 0   ;;  %s5926_s25 = smov 0  }
   0x2   :  { %s5928_s26 = smov 0   ;;  %s5930_s27 = smov 0  }
   0x3 LB: > { %s5945_s28 = sadd.s32 4294967295, %s5871_s27   ;;  %s4699_s29 = sadd.s32 4294967294, %s5871_s27   ;;  %s5871_s27 = sphi %s5930_s27, %s7475_s27   ;;  %s5867_s26 = sphi %s5928_s26, %s7474_s26   ;;  %s5863_s25 = sphi %s5926_s25, %s7473_s25   ;;  %s5859_s24 = sphi %s5924_s24, %s7472_s24  }
   0x4   : > { %s5949_s30 = sadd.s32 1, %s5871_s27   ;;  %s117_s8 = sadd.s32 1, %s5867_s26 }
   0x5   : > { %s114_s9 = ssub.s32 %s5871_s27, %s5949_s30  ;;  %p127_p0 = scmp.ne.s32.totalorder %s5867_s26, %s5863_s25 }
   0x6   : > { %p115_p1 = scmp.eq.s32.totalorder %s114_s9, 0  ;;  %p128_p2 = scmp.eq.s32.totalorder %s5945_s28, 1 }
   0x7   : > { %p133_p3 = scmp.ne.s32.totalorder %s5863_s25, %s5859_s24  ;;  %p134_p4 = scmp.eq.s32.totalorder %s4699_s29, 1 }
   0x8   : > { %s5960_s10 = scalar_select %p115_p1, %s5867_s26, %s117_s8  }
   0x9   : > { %p5962_p5 = por %p128_p2, %p127_p0  ;;  %p5966_p6 = por %p134_p4, %p133_p3 }
   0xa   : > { %p4702_p7 = scmp.ge.s32.totalorder %s5871_s27, 1  ;;  %p247_p8 = scmp.lt.s32.totalorder %s5871_s27, 3 }
   0xc   : > { %p248_p9 = pnand %p4702_p7, %p247_p8 }
   0xe   : > { %251 = sbr.rel (%p248_p9) target bundleno = 597 (0x255), region = 36 }
  0x15   : > { %p292_p10 = scmp.lt.s32.totalorder %s5945_s28, 1  ;;  %v5614_v0 = vld [vmem:[%s7402_s1 + $0x30] sm:$0xff]   ;;  %v733_v1 = vlaneseq  ;;  %v5615_v2 = vld [vmem:[%s7402_s1 + $0x38] sm:$0xff]   ;;  %v5873_v19 = vmov 1983009808   ;;  %s5874_s22 = smov 8  }
  0x16   : > { %5150 = vmatprep.subr.bf16.mxu0 %v5614_v0  ;;  %v5999_v20 = vunpack.c.l.s4 %v5873_v19  ;;  %s5875_s23 = smov 4   ;;  %v5616_v57 = vld [vmem:[%s7402_s1 + $0x40] sm:$0xff]   ;;  %s5876_s14 = smov 12   ;;  %vm492_vm0 = vsmask.f32 1280  ;;  %vm808_vm7 = vcmask 261120  }
  0x17   : > { %s5977_s15 = scalar_select %p292_p10, %s5945_s28, 1  ;;  %5151 = vmatpush3.bf16.msra.mxu0 %v5614_v0  ;;  %v5983_v3 = vshrl.u32 %v733_v1, 7  ;;  %v5617_v0 = vld [vmem:[%s7402_s1 + $0x10] sm:$0xff]   ;;  %vm493_vm1 = vsmask.f32 3336  ;;  %vm4409_vm8 = vcmask 1043456  }
  0x18   : > { %5152 = vmatprep.subr.bf16.mxu0 %v5615_v2  ;;  %5114 = vmatprep.subr.bf16.mxu1 %v5617_v0  ;;  %s5877_s18 = smov 16   ;;  %s5878_s29 = smov 20   ;;  %vm495_vm2 = vsmask.f32 5392  ;;  %vm497_vm3 = vsmask.f32 7448  ;;  %vm494_vm4 = vmor %vm492_vm0, %vm493_vm1 }
  0x19   : > { %s5284_s16 = smul.u32 100, %s5977_s15  ;;  %5115 = vmatpush3.bf16.msra.mxu1 %v5617_v0  ;;  %s5879_s8 = smov 24   ;;  %vm6444_vm5 = vmor %vm494_vm4, %vm495_vm2  ;;  %vm3371_vm9 = vcmask 31744   ;;  %vm3354_vm10 = vcmask 27648  }
  0x1a   : > { %s5880_s9 = smov 28   ;;  %vm6456_vm6 = vmor %vm6444_vm5, %vm497_vm3  ;;  %s5056_s13 = sshll.u32 %s5945_s28, 10 }
  0x1b   : > { %s5988_s21 = scalar_lea.vmem %s7401_s0, %s5284_s16  ;;  %5153 = vmatpush3.bf16.msra.mxu0 %v5615_v2  ;;  %s7309_s19 = scalar_lea.hbm %s7405_s4, %s5056_s13 }
  0x1c   : > { %v4945_v4 = vld [vmem:[%s5988_s21 + $0x4] sm:$0x3]  ;;  %v4946_v5 = vld [vmem:[%s5988_s21 + $0x8] sm:$0x3]  ;;  %v3481_v6 = vld [vmem:[%s5988_s21] sm:$0x7]  ;;  %5162 = vmatprep.subr.bf16.mxu0 %v5616_v57 }
  0x1d   : > { %v3625_v7 = vunpack.c.l.bf16 %v4945_v4  ;;  %v3626_v8 = vunpack.c.l.bf16 %v4946_v5  ;;  %v3482_v9 = vld [vmem:[%s5988_s21 + $0x4] sm:$0x7]  ;;  %v3497_v10 = vunpack.c.l.bf16 %v3481_v6  ;;  %v4947_v11 = vld [vmem:[%s5988_s21 + $0xc] sm:$0x3]  ;;  %v4948_v12 = vld [vmem:[%s5988_s21 + $0x10] sm:$0x3] }
  0x1e   : > { %v3498_v13 = vunpack.c.l.bf16 %v3482_v9  ;;  %v3627_v14 = vunpack.c.l.bf16 %v4947_v11  ;;  %v3628_v15 = vunpack.c.l.bf16 %v4948_v12  ;;  %v3483_v16 = vld [vmem:[%s5988_s21 + $0x8] sm:$0x7]  ;;  %v3484_v17 = vld [vmem:[%s5988_s21 + $0xc] sm:$0x7]  ;;  %v4961_v18 = vld [vmem:[%s5988_s21 + $0x4] sm:$0x7] }
  0x1f   : > { %v5334_v21 = vpack.i.bf16 %v3626_v8, %v3625_v7  ;;  %v3529_v22 = vrot.slane %v3497_v10, 1  ;;  %v3499_v23 = vunpack.c.l.bf16 %v3483_v16  ;;  %v3500_v24 = vunpack.c.l.bf16 %v3484_v17  ;;  %v4962_v25 = vld [vmem:[%s5988_s21 + $0x8] sm:$0x7]  ;;  %v3485_v26 = vld [vmem:[%s5988_s21 + $0x14] sm:$0x7] }
  0x20   : > { %v3530_v27 = vrot.slane %v3498_v13, 1  ;;  %v5339_v28 = vpack.i.bf16 %v3628_v15, %v3627_v14  ;;  %v3737_v29 = vunpack.c.l.bf16 %v4961_v18  ;;  %v3738_v30 = vunpack.c.l.bf16 %v4962_v25  ;;  %v3486_v31 = vld [vmem:[%s5988_s21 + $0x18] sm:$0x7]  ;;  %v4963_v32 = vld [vmem:[%s5988_s21 + $0xc] sm:$0x7] }
  0x21   : > { %5335 = vrot.lane.b32.xlu1 %v5334_v21, %s5874_s22  ;;  %v3531_v33 = vrot.slane %v3499_v23, 1  ;;  %v3532_v34 = vrot.slane %v3500_v24, 1  ;;  %v3501_v35 = vunpack.c.l.bf16 %v3485_v26  ;;  %v3502_v36 = vunpack.c.l.bf16 %v3486_v31  ;;  %v4964_v37 = vld [vmem:[%s5988_s21 + $0x10] sm:$0x7]  ;;  %v3487_v38 = vld [vmem:[%s5988_s21 + $0x1c] sm:$0x7] }
  0x22   : > { %v5344_v39 = vpack.i.bf16 %v3530_v27, %v3529_v22  ;;  %v3769_v40 = vrot.slane %v3737_v29, 1  ;;  %v3770_v41 = vrot.slane %v3738_v30, 1  ;;  %v3739_v42 = vunpack.c.l.bf16 %v4963_v32  ;;  %v3488_v43 = vld [vmem:[%s5988_s21 + $0x20] sm:$0x7]  ;;  %v4977_v44 = vld [vmem:[%s5988_s21 + $0x14] sm:$0x3] }
  0x23   : > { %v6010_v45 = vrot.slane %v3501_v35, 1  ;;  %v6012_v46 = vrot.slane %v3502_v36, 1  ;;  %v3740_v47 = vunpack.c.l.bf16 %v4964_v37  ;;  %v4978_v48 = vld [vmem:[%s5988_s21 + $0x18] sm:$0x3]  ;;  %v5349_v51 = vpack.i.bf16 %v3532_v34, %v3531_v33  ;;  %v4950_v55 = vld [vmem:[%s5988_s21 + $0x1c] sm:$0x3] }
  0x24   : > { %v4949_v49 = vld [vmem:[%s5988_s21 + $0x18] sm:$0x3]  ;;  %5345 = vrot.lane.b32.xlu0 %v5344_v39, %s5875_s23  ;;  %v6018_v52 = vrot.slane %v3739_v42, 1  ;;  %v3503_v53 = vunpack.c.l.bf16 %v3487_v38  ;;  %v3504_v54 = vunpack.c.l.bf16 %v3488_v43  ;;  %v4979_v56 = vld [vmem:[%s5988_s21 + $0x1c] sm:$0x3]  ;;  %v5359_v58 = vpack.i.bf16 %v3770_v41, %v3769_v40 }
  0x25   : > { %5340 = vrot.lane.b32.xlu1 %v5339_v28, %s5874_s22  ;;  %v3772_v59 = vrot.slane %v3740_v47, 1  ;;  %v3865_v60 = vunpack.c.l.bf16 %v4977_v44  ;;  %v3866_v61 = vunpack.c.l.bf16 %v4978_v48  ;;  %v4980_v62 = vld [vmem:[%s5988_s21 + $0x20] sm:$0x3]  ;;  %v3629_v4 = vunpack.c.l.bf16 %v4949_v49  ;;  %v4952_v6 = vld [vmem:[%s5988_s21 + $0x24] sm:$0x3] }
  0x26   : > { %v4951_v63 = vld [vmem:[%s5988_s21 + $0x20] sm:$0x3]  ;;  %v6031_v1 = vrot.slane %v3503_v53, 1  ;;  %v6033_v2 = vrot.slane %v3504_v54, 1  ;;  %v3630_v5 = vunpack.c.l.bf16 %v4950_v55  ;;  %v4965_v7 = vld [vmem:[%s5988_s21 + $0x18] sm:$0x7]  ;;  %v5354_v8 = vpack.i.bf16 %v6012_v46, %v6010_v45 }
  0x27   : > { %v5374_v9 = vpack.i.bf16 %v3772_v59, %v6018_v52  ;;  %v3867_v10 = vunpack.c.l.bf16 %v4979_v56  ;;  %v3868_v11 = vunpack.c.l.bf16 %v4980_v62  ;;  %v4966_v12 = vld [vmem:[%s5988_s21 + $0x1c] sm:$0x7]  ;;  %v3489_v13 = vld [vmem:[%s5988_s21 + $0x28] sm:$0x7]  ;;  %v3490_v14 = vld [vmem:[%s5988_s21 + $0x2c] sm:$0x7]  ;;  %v5379_v16 = vpack.i.bf16 %v3866_v61, %v3865_v60 }
  0x28   : > { %5350 = vrot.lane.b32.xlu0 %v5349_v51, %s5875_s23  ;;  %v5364_v15 = vpack.i.bf16 %v6033_v2, %v6031_v1  ;;  %v6046_v17 = vpack.i.bf16 %v3630_v5, %v3629_v4  ;;  %v3631_v18 = vunpack.c.l.bf16 %v4951_v63  ;;  %v3491_v19 = vld [vmem:[%s5988_s21 + $0x30] sm:$0x7]  ;;  %v3492_v21 = vld [vmem:[%s5988_s21 + $0x34] sm:$0x7]  ;;  %v3632_v23 = vunpack.c.l.bf16 %v4952_v6  ;;  %v4994_v27 = vld [vmem:[%s5988_s21 + $0x18] sm:$0x7] }
  0x29   : > { %v4993_v22 = vld [vmem:[%s5988_s21 + $0x14] sm:$0x7]  ;;  %5360 = vrot.lane.b32.xlu1 %v5359_v58, %s5876_s14  ;;  %v3741_v24 = vunpack.c.l.bf16 %v4965_v7  ;;  %v3742_v25 = vunpack.c.l.bf16 %v4966_v12  ;;  %v3505_v26 = vunpack.c.l.bf16 %v3489_v13  ;;  %v4995_v28 = vld [vmem:[%s5988_s21 + $0x1c] sm:$0x7]  ;;  %v6054_v29 = vpack.i.bf16 %v3868_v11, %v3867_v10  ;;  %v4996_v33 = vld [vmem:[%s5988_s21 + $0x20] sm:$0x7] }
  0x2a   : > { %v3506_v30 = vunpack.c.l.bf16 %v3490_v14  ;;  %v3507_v31 = vunpack.c.l.bf16 %v3491_v19  ;;  %v3508_v32 = vunpack.c.l.bf16 %v3492_v21  ;;  %v4967_v34 = vld [vmem:[%s5988_s21 + $0x20] sm:$0x7]  ;;  %v4968_v35 = vld [vmem:[%s5988_s21 + $0x24] sm:$0x7]  ;;  %v3977_v39 = vunpack.c.l.bf16 %v4993_v22  ;;  %v4981_v40 = vld [vmem:[%s5988_s21 + $0x28] sm:$0x3] }
  0x2b   : > { %v6059_v36 = vrot.slane %v3741_v24, 1  ;;  %v6061_v37 = vrot.slane %v3742_v25, 1  ;;  %v6063_v38 = vrot.slane %v3505_v26, 1  ;;  %v3978_v44 = vunpack.c.l.bf16 %v4994_v27  ;;  %v4982_v45 = vld [vmem:[%s5988_s21 + $0x2c] sm:$0x3]  ;;  %v5621_v46 = vld [vmem:[%s7402_s1 + $0x18] sm:$0xff]  }
  0x2c   : > { %5355 = vrot.lane.b32.xlu0 %v5354_v8, %s5875_s23  ;;  %v6067_v41 = vrot.slane %v3506_v30, 1  ;;  %v6069_v42 = vrot.slane %v3507_v31, 1  ;;  %v6071_v43 = vrot.slane %v3508_v32, 1  ;;  %v6078_v47 = vpack.i.bf16 %v3632_v23, %v3631_v18  ;;  %v4953_v52 = vld [vmem:[%s5988_s21 + $0x2c] sm:$0x3]  ;;  %5116 = vmatprep.subr.bf16.mxu1 %v5621_v46 }
  0x2d   : > { %5375 = vrot.lane.b32.xlu1 %v5374_v9, %s5876_s14  ;;  %v6080_v48 = vrot.slane %v3977_v39, 1  ;;  %v3979_v49 = vunpack.c.l.bf16 %v4995_v28  ;;  %v3980_v51 = vunpack.c.l.bf16 %v4996_v33  ;;  %v4954_v53 = vld [vmem:[%s5988_s21 + $0x30] sm:$0x3]  ;;  %v5399_v54 = vpack.i.bf16 %v6061_v37, %v6059_v36  ;;  %v4955_v58 = vld [vmem:[%s5988_s21 + $0x34] sm:$0x3]  ;;  %5117 = vmatpush3.bf16.msra.mxu1 %v5621_v46 }
  0x2e   : > { %v5394_v55 = vpack.i.bf16 %v6067_v41, %v6063_v38  ;;  %v6088_v56 = vrot.slane %v3978_v44, 1  ;;  %v3743_v57 = vunpack.c.l.bf16 %v4967_v34  ;;  %v4956_v59 = vld [vmem:[%s5988_s21 + $0x38] sm:$0x3]  ;;  %v3744_v62 = vunpack.c.l.bf16 %v4968_v35  ;;  %v5010_v1 = vld [vmem:[%s5988_s21 + $0x1c] sm:$0x3] }
  0x2f   : > { %v6092_v60 = vrot.slane %v3979_v49, 1  ;;  %v6094_v61 = vrot.slane %v3980_v51, 1  ;;  %v3869_v63 = vunpack.c.l.bf16 %v4981_v40  ;;  %v5009_v0 = vld [vmem:[%s5988_s21 + $0x18] sm:$0x3]  ;;  %v5409_v2 = vpack.i.bf16 %v6071_v43, %v6069_v42  ;;  %v5011_v7 = vld [vmem:[%s5988_s21 + $0x20] sm:$0x3] }
  0x30   : > { %5365 = vrot.lane.b32.xlu0 %v5364_v15, %s5875_s23  ;;  %v6101_v4 = vrot.slane %v3743_v57, 1  ;;  %v3870_v5 = vunpack.c.l.bf16 %v4982_v45  ;;  %v3633_v6 = vunpack.c.l.bf16 %v4953_v52  ;;  %v5012_v8 = vld [vmem:[%s5988_s21 + $0x24] sm:$0x3]  ;;  %v5404_v9 = vpack.i.bf16 %v6088_v56, %v6080_v48  ;;  %v4983_v13 = vld [vmem:[%s5988_s21 + $0x30] sm:$0x3] }
  0x31   : > { %5380 = vrot.lane.b32.xlu1 %v5379_v16, %s5877_s18  ;;  %v6108_v10 = vrot.slane %v3744_v62, 1  ;;  %v3634_v11 = vunpack.c.l.bf16 %v4954_v53  ;;  %v3635_v12 = vunpack.c.l.bf16 %v4955_v58  ;;  %v4984_v14 = vld [vmem:[%s5988_s21 + $0x34] sm:$0x3]  ;;  %v5419_v15 = vpack.i.bf16 %v6094_v61, %v6092_v60  ;;  %v4969_v16 = vld [vmem:[%s5988_s21 + $0x2c] sm:$0x7] }
  0x32   : > { %v3636_v18 = vunpack.c.l.bf16 %v4956_v59  ;;  %v4105_v19 = vunpack.c.l.bf16 %v5009_v0  ;;  %v4106_v21 = vunpack.c.l.bf16 %v5010_v1  ;;  %v4970_v22 = vld [vmem:[%s5988_s21 + $0x30] sm:$0x7]  ;;  %v3493_v23 = vld [vmem:[%s5988_s21 + $0x3c] sm:$0x7]  ;;  %v6119_v25 = vpack.i.bf16 %v3870_v5, %v3869_v63  ;;  %v3494_v28 = vld [vmem:[%s5988_s21 + $0x40] sm:$0x7] }
  0x33   : > { %v5414_v24 = vpack.i.bf16 %v6108_v10, %v6101_v4  ;;  %v4107_v26 = vunpack.c.l.bf16 %v5011_v7  ;;  %v4108_v27 = vunpack.c.l.bf16 %v5012_v8  ;;  %v5025_v30 = vld [vmem:[%s5988_s21 + $0x18] sm:$0x7]  ;;  %v5026_v31 = vld [vmem:[%s5988_s21 + $0x1c] sm:$0x7]  ;;  %v6126_v32 = vpack.i.bf16 %v3634_v11, %v3633_v6  ;;  %v4997_v39 = vld [vmem:[%s5988_s21 + $0x28] sm:$0x7] }
  0x34   : > { %5370 = vrot.lane.b32.xlu0 %v6046_v17, %s5874_s22  ;;  %v6128_v33 = vpack.i.bf16 %v3636_v18, %v3635_v12  ;;  %v6130_v34 = vpack.i.bf16 %v4106_v21, %v4105_v19  ;;  %v3871_v35 = vunpack.c.l.bf16 %v4983_v13  ;;  %v3872_v40 = vunpack.c.l.bf16 %v4984_v14  ;;  %v4998_v17 = vld [vmem:[%s5988_s21 + $0x2c] sm:$0x7]  ;;  %v4971_v57 = vld [vmem:[%s5988_s21 + $0x34] sm:$0x7]  ;;  %v4972_v58 = vld [vmem:[%s5988_s21 + $0x38] sm:$0x7] }
  0x35   : > { %5390 = vrot.lane.b32.xlu1 %v6054_v29, %s5877_s18  ;;  %v3745_v44 = vunpack.c.l.bf16 %v4969_v16  ;;  %v3746_v45 = vunpack.c.l.bf16 %v4970_v22  ;;  %v3509_v46 = vunpack.c.l.bf16 %v3493_v23  ;;  %v6136_v49 = vpack.i.bf16 %v4108_v27, %v4107_v26  ;;  %v3495_v59 = vld [vmem:[%s5988_s21 + $0x44] sm:$0x7]  ;;  %v3496_v1 = vld [vmem:[%s5988_s21 + $0x48] sm:$0x7]  ;;  %v5027_v12 = vld [vmem:[%s5988_s21 + $0x20] sm:$0x7] }
  0x36   : > { %v3510_v51 = vunpack.c.l.bf16 %v3494_v28  ;;  %v4217_v52 = vunpack.c.l.bf16 %v5025_v30  ;;  %v4218_v53 = vunpack.c.l.bf16 %v5026_v31  ;;  %v3981_v0 = vunpack.c.l.bf16 %v4997_v39  ;;  %v6151_v5 = vld [vmem:[%s7402_s1] sm:$0xff]   ;;  %v4999_v21 = vld [vmem:[%s5988_s21 + $0x30] sm:$0x7]  ;;  %v4985_v23 = vld [vmem:[%s5988_s21 + $0x3c] sm:$0x3] }
  0x37   : > { %v6141_v62 = vrot.slane %v3745_v44, 1  ;;  %v6143_v63 = vrot.slane %v3746_v45, 1  ;;  %v6145_v29 = vrot.slane %v3509_v46, 1  ;;  %7419 = vst [vmem:[#allocation5_spill] sm:$0xff] %v6151_v5  ;;  %v3982_v11 = vunpack.c.l.bf16 %v4998_v17  ;;  %v5028_v19 = vld [vmem:[%s5988_s21 + $0x24] sm:$0x7]  ;;  %5126 = vmatprep.subr.bf16.mxu1 %v6151_v5 }
  0x38   : > { %5385 = vrot.lane.b32.xlu0 %v6078_v47, %s5874_s22  ;;  %v6155_v6 = vrot.slane %v3510_v51, 1  ;;  %v6157_v7 = vrot.slane %v4217_v52, 1  ;;  %v6159_v8 = vrot.slane %v4218_v53, 1  ;;  %v6166_v13 = vpack.i.bf16 %v3872_v40, %v3871_v35  ;;  %v4986_v31 = vld [vmem:[%s5988_s21 + $0x40] sm:$0x3] }
  0x39   : > { %5400 = vrot.lane.b32.xlu1 %v5399_v54, %s5876_s14  ;;  %v6168_v14 = vrot.slane %v3981_v0, 1  ;;  %v3747_v47 = vunpack.c.l.bf16 %v4971_v57  ;;  %v3748_v18 = vunpack.c.l.bf16 %v4972_v58  ;;  %v6177_v36 = vrot.slane %v3982_v11, 1  ;;  %v5000_v54 = vld [vmem:[%s5988_s21 + $0x34] sm:$0x7]  ;;  %v4957_v35 = vld [vmem:[%s5988_s21 + $0x40] sm:$0x3] }
  0x3a   : > { %v3511_v37 = vunpack.c.l.bf16 %v3495_v59  ;;  %v3512_v28 = vunpack.c.l.bf16 %v3496_v1  ;;  %v4219_v30 = vunpack.c.l.bf16 %v5027_v12  ;;  %v4220_v44 = vunpack.c.l.bf16 %v5028_v19  ;;  %v4958_v46 = vld [vmem:[%s5988_s21 + $0x44] sm:$0x3]  ;;  %v4959_v17 = vld [vmem:[%s5988_s21 + $0x48] sm:$0x3]  ;;  %v4960_v52 = vld [vmem:[%s5988_s21 + $0x4c] sm:$0x3] }
  0x3b   : > { %v6181_v26 = vrot.slane %v3747_v47, 1  ;;  %v6183_v27 = vrot.slane %v3748_v18, 1  ;;  %v3983_v45 = vunpack.c.l.bf16 %v4999_v21  ;;  %v3984_v51 = vunpack.c.l.bf16 %v5000_v54  ;;  %v5013_v53 = vld [vmem:[%s5988_s21 + $0x2c] sm:$0x3]  ;;  %v5014_v43 = vld [vmem:[%s5988_s21 + $0x30] sm:$0x3] }
  0x3c   : > { %5395 = vrot.lane.b32.xlu0 %v5394_v55, %s5875_s23  ;;  %v6193_v40 = vrot.slane %v3511_v37, 1  ;;  %v6203_v41 = vrot.slane %v3512_v28, 1  ;;  %v6205_v55 = vrot.slane %v4219_v30, 1  ;;  %v6209_v57 = vrot.slane %v4220_v44, 1  ;;  %v5016_v47 = vld [vmem:[%s5988_s21 + $0x38] sm:$0x3] }
  0x3d   : > { %5410 = vrot.lane.b32.xlu1 %v5409_v2, %s5875_s23  ;;  %v6211_v58 = vrot.slane %v3983_v45, 1  ;;  %v3873_v59 = vunpack.c.l.bf16 %v4985_v23  ;;  %v3874_v42 = vunpack.c.l.bf16 %v4986_v31  ;;  %v5015_v2 = vld [vmem:[%s5988_s21 + $0x34] sm:$0x3]  ;;  %v6217_v1 = vrot.slane %v3984_v51, 1  ;;  %v4987_v18 = vld [vmem:[%s5988_s21 + $0x44] sm:$0x3] }
  0x3e   : > { %v3637_v11 = vunpack.c.l.bf16 %v4957_v35  ;;  %v3638_v12 = vunpack.c.l.bf16 %v4958_v46  ;;  %v3639_v37 = vunpack.c.l.bf16 %v4959_v17  ;;  %v3640_v54 = vunpack.c.l.bf16 %v4960_v52  ;;  %v4988_v23 = vld [vmem:[%s5988_s21 + $0x48] sm:$0x3]  ;;  %v5001_v28 = vld [vmem:[%s5988_s21 + $0x3c] sm:$0x7]  ;;  %v5002_v30 = vld [vmem:[%s5988_s21 + $0x40] sm:$0x7] }
  0x3f   : > { %v6238_v56 = vpack.i.bf16 %v3874_v42, %v3873_v59  ;;  %v4110_v31 = vunpack.c.l.bf16 %v5014_v43  ;;  %v4973_v35 = vld [vmem:[%s5988_s21 + $0x40] sm:$0x7]  ;;  %v4974_v44 = vld [vmem:[%s5988_s21 + $0x44] sm:$0x7]  ;;  %v4975_v45 = vld [vmem:[%s5988_s21 + $0x48] sm:$0x7]  ;;  %v4111_v17 = vunpack.c.l.bf16 %v5015_v2  ;;  %v4112_v51 = vunpack.c.l.bf16 %v5016_v47 }
  0x40   : > { %5405 = vrot.lane.b32.xlu0 %v5404_v9, %s5878_s29  ;;  %v4109_v9 = vunpack.c.l.bf16 %v5013_v53  ;;  %v6243_v46 = vpack.i.bf16 %v3638_v12, %v3637_v11  ;;  %v3875_v52 = vunpack.c.l.bf16 %v4987_v18  ;;  %v4976_v60 = vld [vmem:[%s5988_s21 + $0x4c] sm:$0x7]  ;;  %v6246_v61 = vpack.i.bf16 %v3640_v54, %v3639_v37  ;;  %v5030_v12 = vld [vmem:[%s5988_s21 + $0x30] sm:$0x7]  ;;  %v5031_v47 = vld [vmem:[%s5988_s21 + $0x34] sm:$0x7] }
  0x41   : > { %5420 = vrot.lane.b32.xlu1 %v5419_v15, %s5878_s29  ;;  %v3876_v15 = vunpack.c.l.bf16 %v4988_v23  ;;  %v3985_v48 = vunpack.c.l.bf16 %v5001_v28  ;;  %v3986_v59 = vunpack.c.l.bf16 %v5002_v30  ;;  %v5029_v53 = vld [vmem:[%s5988_s21 + $0x2c] sm:$0x7]  ;;  %v3749_v43 = vunpack.c.l.bf16 %v4973_v35  ;;  %v5003_v54 = vld [vmem:[%s5988_s21 + $0x44] sm:$0x7]  ;;  %v5023_v16 = vld [vmem:[%s5988_s21 + $0x5c] sm:$0x3] }
  0x42   : > { %v6253_v42 = vpack.i.bf16 %v4110_v31, %v4109_v9  ;;  %v3750_v2 = vunpack.c.l.bf16 %v4974_v44  ;;  %v3751_v11 = vunpack.c.l.bf16 %v4975_v45  ;;  %v6259_v18 = vpack.i.bf16 %v4112_v51, %v4111_v17  ;;  %v5004_v9 = vld [vmem:[%s5988_s21 + $0x48] sm:$0x7]  ;;  %v5017_v31 = vld [vmem:[%s5988_s21 + $0x40] sm:$0x3]  ;;  %v5018_v17 = vld [vmem:[%s5988_s21 + $0x44] sm:$0x3] }
  0x43   : > { %v6261_v37 = vrot.slane %v3985_v48, 1  ;;  %v6263_v4 = vrot.slane %v3986_v59, 1  ;;  %v3752_v10 = vunpack.c.l.bf16 %v4976_v60  ;;  %v6267_v23 = vpack.i.bf16 %v3876_v15, %v3875_v52  ;;  %v4989_v51 = vld [vmem:[%s5988_s21 + $0x50] sm:$0x3]  ;;  %v5034_v19 = vld [vmem:[%s5988_s21 + $0x44] sm:$0x7] }
  0x44   : > { %5415 = vrot.lane.b32.xlu0 %v5414_v24, %s5876_s14  ;;  %v5032_v24 = vld [vmem:[%s5988_s21 + $0x38] sm:$0x7]  ;;  %v6269_v28 = vrot.slane %v3749_v43, 1  ;;  %v6271_v30 = vrot.slane %v3750_v2, 1  ;;  %v6275_v35 = vrot.slane %v3751_v11, 1  ;;  %v4222_v44 = vunpack.c.l.bf16 %v5030_v12 }
  0x45   : > { %5430 = vrot.lane.b32.xlu1 %v6119_v25, %s5877_s18  ;;  %v4221_v25 = vunpack.c.l.bf16 %v5029_v53  ;;  %v6277_v48 = vrot.slane %v3752_v10, 1  ;;  %v4223_v45 = vunpack.c.l.bf16 %v5031_v47  ;;  %v4224_v15 = vunpack.c.l.bf16 %v5032_v24  ;;  %v4990_v53 = vld [vmem:[%s5988_s21 + $0x54] sm:$0x3]  ;;  %v5019_v43 = vld [vmem:[%s5988_s21 + $0x48] sm:$0x3] }
  0x46   : > { %v3987_v59 = vunpack.c.l.bf16 %v5003_v54  ;;  %v6293_v11 = vrot.slane %v4222_v44, 1  ;;  %v3988_v12 = vunpack.c.l.bf16 %v5004_v9  ;;  %v5020_v47 = vld [vmem:[%s5988_s21 + $0x4c] sm:$0x3]  ;;  %v4991_v10 = vld [vmem:[%s5988_s21 + $0x58] sm:$0x3]  ;;  %v4114_v52 = vunpack.c.l.bf16 %v5018_v17 }
  0x47   : > { %v6285_v60 = vrot.slane %v4221_v25, 1  ;;  %v6299_v24 = vrot.slane %v4224_v15, 1  ;;  %v4113_v25 = vunpack.c.l.bf16 %v5017_v31  ;;  %v5033_v2 = vld [vmem:[%s5988_s21 + $0x40] sm:$0x7]  ;;  %v3878_v9 = vunpack.c.l.bf16 %v4990_v53  ;;  %v5005_v15 = vld [vmem:[%s5988_s21 + $0x50] sm:$0x7] }
  0x48   : > { %5425 = vrot.lane.b32.xlu0 %v6126_v32, %s5874_s22  ;;  %v6295_v32 = vrot.slane %v4223_v45, 1  ;;  %v6301_v54 = vrot.slane %v3987_v59, 1  ;;  %v6307_v21 = vrot.slane %v3988_v12, 1  ;;  %v3877_v45 = vunpack.c.l.bf16 %v4989_v51  ;;  %v5006_v51 = vld [vmem:[%s5988_s21 + $0x54] sm:$0x7] }
  0x49   : > { %5440 = vrot.lane.b32.xlu1 %v6128_v33, %s5874_s22  ;;  %v4992_v33 = vld [vmem:[%s5988_s21 + $0x5c] sm:$0x3]  ;;  %v4115_v59 = vunpack.c.l.bf16 %v5019_v43  ;;  %v4116_v12 = vunpack.c.l.bf16 %v5020_v47  ;;  %v5035_v53 = vld [vmem:[%s5988_s21 + $0x48] sm:$0x7]  ;;  %v5036_v44 = vld [vmem:[%s5988_s21 + $0x4c] sm:$0x7]  ;;  %v6324_v50 = vpack.i.bf16 %v4114_v52, %v4113_v25  ;;  %v3879_v0 = vunpack.c.l.bf16 %v4991_v10 }
  0x4a   : > { %v6326_v31 = vpack.i.bf16 %v3878_v9, %v3877_v45  ;;  %v5007_v43 = vld [vmem:[%s5988_s21 + $0x58] sm:$0x7]  ;;  %v5008_v47 = vld [vmem:[%s5988_s21 + $0x5c] sm:$0x7]  ;;  %v3880_v17 = vunpack.c.l.bf16 %v4992_v33  ;;  %v4225_v38 = vunpack.c.l.bf16 %v5033_v2  ;;  %v4226_v39 = vunpack.c.l.bf16 %v5034_v19  ;;  %v5024_v5 = vld [vmem:[%s5988_s21 + $0x60] sm:$0x3] }
  0x4b   : > { %v3989_v22 = vunpack.c.l.bf16 %v5005_v15  ;;  %v6333_v52 = vpack.i.bf16 %v4116_v12, %v4115_v59  ;;  %v3990_v25 = vunpack.c.l.bf16 %v5006_v51  ;;  %v4227_v45 = vunpack.c.l.bf16 %v5035_v53  ;;  %v5022_v9 = vld [vmem:[%s5988_s21 + $0x58] sm:$0x3]  ;;  %v5037_v59 = vld [vmem:[%s5988_s21 + $0x54] sm:$0x7] }
  0x4c   : > { %5435 = vrot.lane.b32.xlu0 %v6130_v34, %s5879_s8  ;;  %7420 = vst [vmem:[#allocation6_spill] sm:$0xff] %v6326_v31  ;;  %v4228_v10 = vunpack.c.l.bf16 %v5036_v44  ;;  %v5039_v34 = vld [vmem:[%s5988_s21 + $0x5c] sm:$0x7]  ;;  %v5040_v31 = vld [vmem:[%s5988_s21 + $0x60] sm:$0x7]  ;;  %v6340_v19 = vrot.slane %v4225_v38, 1  ;;  %v3991_v15 = vunpack.c.l.bf16 %v5007_v43  ;;  %v7422_v44 = vpack.i.bf16 %v6143_v63, %v6141_v62 }
  0x4d   : > { %5450 = vrot.lane.b32.xlu1 %v6136_v49, %s5879_s8  ;;  %v5021_v49 = vld [vmem:[%s5988_s21 + $0x54] sm:$0x3]  ;;  %v6342_v2 = vrot.slane %v4226_v39, 1  ;;  %v6344_v33 = vrot.slane %v3989_v22, 1  ;;  %v6351_v12 = vrot.slane %v3990_v25, 1  ;;  %v6353_v51 = vrot.slane %v4227_v45, 1 }
  0x4e   : > { %v3992_v39 = vunpack.c.l.bf16 %v5008_v47  ;;  %v5038_v38 = vld [vmem:[%s5988_s21 + $0x58] sm:$0x7]  ;;  %v6358_v22 = vpack.i.bf16 %v3880_v17, %v3879_v0  ;;  %v6360_v53 = vrot.slane %v3991_v15, 1  ;;  %v4119_v43 = vunpack.c.l.bf16 %v5023_v16  ;;  %v6363_v63 = vld [vmem:[%s5988_s21] sm:$0x3] }
  0x4f   : > { %7421 = vst [vmem:[#allocation7_spill] sm:$0xff] %v6344_v33  ;;  %7423 = vst [vmem:[#allocation8_spill] sm:$0xff] %v6353_v51  ;;  %v4120_v62 = vunpack.c.l.bf16 %v5024_v5  ;;  %v6366_v25 = vld [vmem:[%s5988_s21 + $0x4] sm:$0x3]  ;;  %v4117_v0 = vunpack.c.l.bf16 %v5021_v49  ;;  %v6375_v17 = vld [vmem:[%s5988_s21 + $0x8] sm:$0x3]  ;;  %v7427_v5 = vpack.i.bf16 %v6155_v6, %v6145_v29  ;;  %v4231_v45 = vunpack.c.l.bf16 %v5039_v34 }
  0x50   : > { %5445 = vrot.lane.b32.xlu0 %v6166_v13, %s5877_s18  ;;  %v6355_v13 = vrot.slane %v4228_v10, 1  ;;  %v6372_v10 = vrot.slane %v3992_v39, 1  ;;  %7425 = vst [vmem:[#allocation10_spill] sm:$0xff] %v6375_v17  ;;  %v6378_v15 = vld [vmem:[%s5988_s21 + $0xc] sm:$0x3]  ;;  %v4232_v47 = vunpack.c.l.bf16 %v5040_v31  ;;  %v7430_v33 = vpack.i.bf16 %v6159_v8, %v6157_v7 }
  0x51   : > { %5460 = vrot.lane.b32.xlu1 %v7422_v44, %s5876_s14  ;;  %7426 = vst [vmem:[#allocation11_spill] sm:$0xff] %v6378_v15  ;;  %v4118_v44 = vunpack.c.l.bf16 %v5022_v9  ;;  %v6387_v39 = vld [vmem:[%s5988_s21 + $0x14] sm:$0x3]  ;;  %v6390_v49 = vld [vmem:[%s5988_s21 + $0x18] sm:$0x3]  ;;  %v6398_v6 = vpack.i.bf16 %v4120_v62, %v4119_v43  ;;  %v4229_v34 = vunpack.c.l.bf16 %v5037_v59  ;;  %v4230_v9 = vunpack.c.l.bf16 %v5038_v38 }
  0x52   : > { %7424 = vst [vmem:[#allocation9_spill] sm:$0xff] %v6355_v13  ;;  %7428 = vst [vmem:[#allocation12_spill] sm:$0xff] %v6387_v39  ;;  %v4783_v31 = vld.sshfl [vmem:[%s5988_s21 + $0x4] sm:$0x13 pattern:$0x76325410]  ;;  %v7431_v62 = vpack.i.bf16 %v6177_v36, %v6168_v14  ;;  %v7433_v14 = vunpack.c.0.s8 %v5999_v20  ;;  %v7434_v59 = vpack.i.bf16 %v6203_v41, %v6193_v40 }
  0x53   : > { %7429 = vst [vmem:[#allocation13_spill] sm:$0xff] %v6390_v49  ;;  %v6403_v16 = vrot.slane %v4231_v45, 1  ;;  %v6405_v51 = vrot.slane %v4232_v47, 1  ;;  %v6409_v8 = vrot.slane %v4229_v34, 1  ;;  %v1423_v43 = vshrl.u32 %v4783_v31, 16 }
  0x54   : > { %5455 = vrot.lane.b32.xlu0 %v7427_v5, %s5875_s23  ;;  %v6401_v5 = vpack.i.bf16 %v4118_v44, %v4117_v0  ;;  %v4784_v7 = vld.sshfl [vmem:[%s5988_s21 + $0x8] sm:$0x13 pattern:$0x76325410]  ;;  %v6437_v36 = vsub.s32 %v7433_v14, %v5983_v3  ;;  %v1426_v13 = vshll.u32 %v4783_v31, 16 }
  0x55   : > { %5470 = vrot.lane.b32.xlu1 %v7430_v33, %s5880_s9  ;;  %v6411_v33 = vrot.slane %v4230_v9, 1  ;;  %v4785_v38 = vld.sshfl [vmem:[%s5988_s21 + $0xc] sm:$0x13 pattern:$0x76325410]  ;;  %v7432_v9 = vpack.i.bf16 %v6183_v27, %v6181_v26  ;;  %v1309_v0 = vcombine.high %v4784_v7, %v4784_v7  ;;  %v1437_v27 = vshrl.u32 %v4784_v7, 16 }
  0x56   : > { %v4786_v34 = vld.sshfl [vmem:[%s5988_s21 + $0x10] sm:$0x13 pattern:$0x76325410]  ;;  %v1317_v44 = vcombine.high %v4785_v38, %v4785_v38  ;;  %v1425_v20 = vrot.slane %v1423_v43, 6  ;;  %v1428_v14 = vrot.slane %v1426_v13, 7 }
  0x57   : > { %v1325_v47 = vcombine.high %v4786_v34, %v4786_v34  ;;  %v1446_v45 = vshll.u32 %v1309_v0, 16  ;;  %v1451_v29 = vshrl.u32 %v4785_v38, 16  ;;  %v1454_v49 = vshll.u32 %v4785_v38, 16 }
  0x58   : > { %5465 = vrot.lane.b32.xlu0 %v7431_v62, %s5878_s29  ;;  %v1301_v62 = vcombine.high %v4783_v31, %v4783_v31  ;;  %v7437_v31 = vpack.i.bf16 %v6209_v57, %v6205_v55  ;;  %v1439_v0 = vrot.slane %v1437_v27, 6  ;;  %v1460_v17 = vshll.u32 %v1317_v44, 16  ;;  %v4789_v27 = vld.sshfl [vmem:[%s5988_s21 + $0x20] sm:$0x13 pattern:$0x76325410] }
  0x59   : > { %5480 = vrot.lane.b32.xlu1 %v7432_v9, %s5876_s14  ;;  %v1440_v9 = vshll.u32 %v4784_v7, 16  ;;  %v1448_v41 = vrot.slane %v1446_v45, 7  ;;  %v1453_v39 = vrot.slane %v1451_v29, 6  ;;  %v1456_v15 = vrot.slane %v1454_v49, 7 }
  0x5a   : > { %v1432_v26 = vshll.u32 %v1301_v62, 16  ;;  %v1429_v62 = vor.u32 %v1428_v14, %v1425_v20  ;;  %v1465_v57 = vshrl.u32 %v4786_v34, 16  ;;  %v1468_v43 = vshll.u32 %v4786_v34, 16 }
  0x5b   : > { %v1442_v40 = vrot.slane %v1440_v9, 7  ;;  %v1474_v38 = vshll.u32 %v1325_v47, 16  ;;  %v7440_v29 = vpack.i.bf16 %v6217_v1, %v6211_v58  ;;  %v1457_v45 = vor.u32 %v1456_v15, %v1453_v39 }
  0x5c   : > { %5475 = vrot.lane.b32.xlu0 %v7434_v59, %s5875_s23  ;;  %v1434_v7 = vrot.slane %v1432_v26, 7  ;;  %v4787_v59 = vld.sshfl [vmem:[%s5988_s21 + $0x18] sm:$0x13 pattern:$0x76325410]  ;;  %v1430_v49 = vrot.slane %v1429_v62, 2  ;;  %v1349_v58 = vcombine.high %v4789_v27, %v4789_v27 }
  0x5d   : > { %5490 = vrot.lane.b32.xlu1 %v7437_v31, %s5880_s9  ;;  %v1443_v55 = vor.u32 %v1442_v40, %v1439_v0  ;;  %v4788_v26 = vld.sshfl [vmem:[%s5988_s21 + $0x1c] sm:$0x13 pattern:$0x76325410]  ;;  %v1462_v44 = vrot.slane %v1460_v17, 7  ;;  %v1333_v9 = vcombine.high %v4787_v59, %v4787_v59  ;;  %v1467_v20 = vrot.slane %v1465_v57, 6 }
  0x5e   : > { %v1470_v14 = vrot.slane %v1468_v43, 7  ;;  %v1476_v34 = vrot.slane %v1474_v38, 7  ;;  %v6470_v47 = vsel %vm6456_vm6, %v1430_v49, %v1434_v7  ;;  %v1458_v31 = vrot.slane %v1457_v45, 2 }
  0x5f   : > { %v1444_v3 = vrot.slane %v1443_v55, 2  ;;  %v4790_v0 = vld.sshfl [vmem:[%s5988_s21 + $0x24] sm:$0x13 pattern:$0x76325410]  ;;  %v1341_v40 = vcombine.high %v4788_v26, %v4788_v26  ;;  %v1482_v62 = vshll.u32 %v4787_v59, 16 }
  0x60   : > { %5485 = vrot.lane.b32.xlu0 %v7440_v29, %s5878_s29  ;;  %v1471_v17 = vor.u32 %v1470_v14, %v1467_v20  ;;  %v1357_v15 = vcombine.high %v4790_v0, %v4790_v0  ;;  %v6481_v39 = vsel %vm6456_vm6, %v1458_v31, %v1462_v44  ;;  %v1488_v55 = vshll.u32 %v1333_v9, 16  ;;  %v6494_v31 = vld [vmem:[%s5988_s21 + $0x1c] sm:$0x3] }
  0x61   : > { %5500 = vrot.lane.b32.xlu1 %v6238_v56, %s5877_s18  ;;  %v6475_v1 = vsel %vm6456_vm6, %v1444_v3, %v1448_v41  ;;  %v1479_v56 = vshrl.u32 %v4787_v59, 16  ;;  %v1493_v43 = vshrl.u32 %v4788_v26, 16  ;;  %v1496_v38 = vshll.u32 %v4788_v26, 16 }
  0x62   : > { %v1651_v7 = vcombine.low %v6470_v47, %v6475_v1  ;;  %v1472_v41 = vrot.slane %v1471_v17, 2  ;;  %v1484_v29 = vrot.slane %v1482_v62, 7  ;;  %v1490_v49 = vrot.slane %v1488_v55, 7 }
  0x63   : > { %v1481_v57 = vrot.slane %v1479_v56, 6  ;;  %v1502_v45 = vshll.u32 %v1341_v40, 16  ;;  %v1495_v59 = vrot.slane %v1493_v43, 6  ;;  %v1498_v9 = vrot.slane %v1496_v38, 7  ;;  %v6497_v40 = vld [vmem:[%s5988_s21 + $0x20] sm:$0x3] }
  0x64   : > { %5495 = vrot.lane.b32.xlu0 %v6243_v46, %s5874_s22  ;;  %v1659_v46 = vrot.slane %v1651_v7, %v6437_v36  ;;  %v1477_v44 = vsel %vm6456_vm6, %v1472_v41, %v1476_v34  ;;  %v1510_v14 = vshll.u32 %v4789_v27, 16  ;;  %v6500_v34 = vld.sshfl [vmem:[%s5988_s21 + $0x14] sm:$0xf pattern:$0x76325410]  ;;  %v1516_v7 = vshll.u32 %v1349_v58, 16 }
  0x65   : > { %5510 = vrot.lane.b32.xlu1 %v6246_v61, %s5874_s22  ;;  %v1507_v61 = vshrl.u32 %v4789_v27, 16  ;;  %v1652_v26 = vcombine.low %v6481_v39, %v1477_v44  ;;  %v1485_v3 = vor.u32 %v1484_v29, %v1481_v57  ;;  %v1504_v20 = vrot.slane %v1502_v45, 7  ;;  %v6505_v62 = vld.sshfl [vmem:[%s5988_s21 + $0x1c] sm:$0xf pattern:$0x76325410] }
  0x66   : > { %v1499_v17 = vor.u32 %v1498_v9, %v1495_v59  ;;  %v6508_v55 = vld.sshfl [vmem:[%s5988_s21 + $0x28] sm:$0xf pattern:$0x76325410]  ;;  %v1512_v43 = vrot.slane %v1510_v14, 7  ;;  %v1524_v38 = vshll.u32 %v4790_v0, 16  ;;  %v7441_v14 = vpack.i.bf16 %v6263_v4, %v6261_v37 }
  0x67   : > { %v1509_v56 = vrot.slane %v1507_v61, 6  ;;  %v6511_v27 = vld.sshfl [vmem:[%s5988_s21 + $0x30] sm:$0xf pattern:$0x76325410]  ;;  %v1666_v41 = vrot.slane %v1652_v26, %v6437_v36  ;;  %v1486_v57 = vrot.slane %v1485_v3, 2  ;;  %v7442_v4 = vpack.i.bf16 %v6271_v30, %v6269_v28 }
  0x68   : > { %5505 = vrot.lane.b32.xlu0 %v6253_v42, %s5879_s8  ;;  %v1521_v42 = vshrl.u32 %v4790_v0, 16  ;;  %v6515_v29 = vld [vmem:[%s5988_s21 + $0x28] sm:$0x3]  ;;  %v1518_v45 = vrot.slane %v1516_v7, 7  ;;  %v1530_v59 = vshll.u32 %v1357_v15, 16  ;;  %v1526_v3 = vrot.slane %v1524_v38, 7 }
  0x69   : > { %5520 = vrot.lane.b32.xlu1 %v6259_v18, %s5879_s8  ;;  %v1500_v18 = vrot.slane %v1499_v17, 2  ;;  %v6518_v58 = vld [vmem:[%s5988_s21 + $0x2c] sm:$0x3]  ;;  %v1667_v9 = vcombine.low %v1659_v46, %v1666_v41  ;;  %v6524_v61 = vsel %vm6456_vm6, %v1486_v57, %v1490_v49  ;;  %v1513_v26 = vor.u32 %v1512_v43, %v1509_v56 }
  0x6a   : > { %v1523_v44 = vrot.slane %v1521_v42, 6  ;;  %v4709_v0 = vld.sshfl [vmem:[%s5988_s21] sm:$0x13 pattern:$0x76325410]  ;;  %v1532_v17 = vrot.slane %v1530_v59, 7  ;;  %v3456_v46 = vunpack.c.l.bf16 %v6497_v40  ;;  %v3457_v42 = vunpack.c.l.bf16 %v6515_v29 }
  0x6b   : > { %v1505_v15 = vsel %vm6456_vm6, %v1500_v18, %v1504_v20  ;;  %5154 = vmatprep.mubr.msk.bf16.mxu0 %vm808_vm7, %v1667_v9  ;;  %v1514_v49 = vrot.slane %v1513_v26, 2  ;;  %v4713_v37 = vld.sshfl [vmem:[%s5988_s21 + $0x14] sm:$0x13 pattern:$0x76325410]  ;;  %v7443_v38 = vpack.i.bf16 %v6277_v48, %v6275_v35  ;;  %v1870_v28 = vcombine.low %v6500_v34, %v6505_v62 }
  0x6c   : > { %5515 = vrot.lane.b32.xlu0 %v6267_v23, %s5877_s18  ;;  %v3455_v23 = vunpack.c.l.bf16 %v6494_v31  ;;  %v1527_v56 = vor.u32 %v1526_v3, %v1523_v44  ;;  %v1668_v7 = vcombine.low %v6524_v61, %v1505_v15  ;;  %v1887_v30 = vcombine.low %v6508_v55, %v6511_v27  ;;  %v6556_v44 = vld [vmem:[%s5988_s21 + $0x30] sm:$0x3]  ;;  %v6559_v59 = vld.sshfl [vmem:[%s5988_s21 + $0x3c] sm:$0xf pattern:$0x76325410] }
  0x6d   : > { %5530 = vrot.lane.b32.xlu1 %v7441_v14, %s5878_s29  ;;  %v1519_v20 = vsel %vm6456_vm6, %v1514_v49, %v1518_v45  ;;  %v371_v18 = vcombine.high %v4709_v0, %v4709_v0  ;;  %v500_v45 = vshrl.u32 %v4709_v0, 16  ;;  %v503_v26 = vshll.u32 %v4709_v0, 16  ;;  %v6566_v3 = vld [vmem:[%s5988_s21 + $0x34] sm:$0x3] }
  0x6e   : > { %v1528_v41 = vrot.slane %v1527_v56, 2  ;;  %v1676_v57 = vrot.slane %v1668_v7, %v6437_v36  ;;  %v729_v35 = vcombine.low %v6475_v1, %v6481_v39  ;;  %v403_v48 = vcombine.high %v4713_v37, %v4713_v37  ;;  %v6569_v34 = vld.sshfl [vmem:[%s5988_s21 + $0x44] sm:$0xf pattern:$0x76325410] }
  0x6f   : > { %v6572_v62 = vld.sshfl [vmem:[%s5988_s21 + $0x50] sm:$0xf pattern:$0x76325410]  ;;  %v502_v49 = vrot.slane %v500_v45, 6  ;;  %v509_v56 = vshll.u32 %v371_v18, 16  ;;  %v7470_v29 = vunpack.c.l.bf16 %v6566_v3 }
  0x70   : > { %5525 = vrot.lane.b32.xlu0 %v7442_v4, %s5876_s14  ;;  %v1533_v9 = vsel %vm6456_vm6, %v1528_v41, %v1532_v17  ;;  %v556_v7 = vshrl.u32 %v4713_v37, 16  ;;  %v7444_v17 = vpack.i.bf16 %v6293_v11, %v6285_v60  ;;  %v505_v0 = vrot.slane %v503_v26, 7  ;;  %v6587_v60 = vld.sshfl [vmem:[%s5988_s21 + $0x58] sm:$0xf pattern:$0x76325410] }
  0x71   : > { %5540 = vrot.lane.b32.xlu1 %v7443_v38, %s5876_s14  ;;  %v1669_v14 = vcombine.low %v1519_v20, %v1533_v9  ;;  %v6579_v1 = vrot.slane %v729_v35, %v6437_v36  ;;  %v559_v39 = vshll.u32 %v4713_v37, 16  ;;  %v565_v4 = vshll.u32 %v403_v48, 16  ;;  %v4717_v48 = vld.sshfl [vmem:[%s5988_s21 + $0x28] sm:$0x13 pattern:$0x76325410] }
  0x72   : > { %v7445_v41 = vpack.i.bf16 %v6299_v24, %v6295_v32  ;;  %v511_v18 = vrot.slane %v509_v56, 7  ;;  %v558_v45 = vrot.slane %v556_v7, 6  ;;  %v746_v9 = vcombine.low %v1505_v15, %v1519_v20  ;;  %v5618_v32 = vld [vmem:[%s7402_s1 + $0x48] sm:$0xff]  }
  0x73   : > { %v1683_v38 = vrot.slane %v1669_v14, %v6437_v36  ;;  %v506_v11 = vor.u32 %v505_v0, %v502_v49  ;;  %v561_v26 = vrot.slane %v559_v39, 7  ;;  %v567_v35 = vrot.slane %v565_v4, 7  ;;  %v4718_v56 = vld.sshfl [vmem:[%s5988_s21 + $0x2c] sm:$0x13 pattern:$0x76325410] }
  0x74   : > { %5535 = vrot.lane.b32.xlu0 %v7444_v17, %s5880_s9  ;;  %v760_v24 = vrot.slane %v746_v9, %v6437_v36  ;;  %v7446_v15 = vpack.i.bf16 %v6307_v21, %v6301_v54  ;;  %v435_v7 = vcombine.high %v4717_v48, %v4717_v48  ;;  %v443_v0 = vcombine.high %v4718_v56, %v4718_v56  ;;  %v5662_v4 = vld [vmem:[%s7402_s1 + $0x40] sm:$0xff]  }
  0x75   : > { %5550 = vrot.lane.b32.xlu1 %v7445_v41, %s5880_s9  ;;  %v1684_v17 = vcombine.low %v1676_v57, %v1683_v38  ;;  %v507_v20 = vrot.slane %v506_v11, 2  ;;  %v562_v49 = vor.u32 %v561_v26, %v558_v45  ;;  %v4719_v57 = vld.sshfl [vmem:[%s5988_s21 + $0x30] sm:$0x13 pattern:$0x76325410]  ;;  %v612_v39 = vshrl.u32 %v4717_v48, 16 }
  0x76   : > { %v4720_v41 = vld.sshfl [vmem:[%s5988_s21 + $0x34] sm:$0x13 pattern:$0x76325410]  ;;  %v451_v38 = vcombine.high %v4719_v57, %v4719_v57  ;;  %v1921_v9 = vcombine.low %v6572_v62, %v6587_v60  ;;  %v635_v14 = vshll.u32 %v443_v0, 16  ;;  %v640_v43 = vshrl.u32 %v4719_v57, 16 }
  0x77   : > { %5155 = vmatmul.mubr.msk.bf16.vlgmr.msra.gmra.mrb[0].mxu0 %vm808_vm7, %v1684_v17  ;;  %v512_v21 = vsel %vm6456_vm6, %v507_v20, %v511_v18  ;;  %v563_v54 = vrot.slane %v562_v49, 2  ;;  %v6620_v11 = vld [vmem:[%s7402_s1 + $0x50] sm:$0xff]   ;;  %v614_v26 = vrot.slane %v612_v39, 6  ;;  %v7447_v18 = vld [vmem:[#allocation6_spill] sm:$0xff]  ;;  %v621_v20 = vshll.u32 %v435_v7, 16 }
  0x78   : > { %5545 = vrot.lane.b32.xlu0 %v7446_v15, %s5878_s29  ;;  %5163 = vmatpush3.bf16.msra.mxu0 %v5662_v4  ;;  %v728_v45 = vcombine.low %v512_v21, %v6470_v47  ;;  %v615_v15 = vshll.u32 %v4717_v48, 16  ;;  %v626_v49 = vshrl.u32 %v4718_v56, 16  ;;  %v629_v21 = vshll.u32 %v4718_v56, 16 }
  0x79   : > { %5560 = vrot.lane.b32.xlu1 %v6324_v50, %s5879_s8  ;;  %5166 = vmatprep.mubr.msk.bf16.mxu0 %vm808_vm7, %v1870_v28  ;;  %v1904_v50 = vcombine.low %v6559_v59, %v6569_v34  ;;  %v459_v28 = vcombine.high %v4720_v41, %v4720_v41  ;;  %v568_v17 = vsel %vm6456_vm6, %v563_v54, %v567_v35  ;;  %v623_v37 = vrot.slane %v621_v20, 7  ;;  %v4721_v54 = vld.sshfl [vmem:[%s5988_s21 + $0x3c] sm:$0x13 pattern:$0x76325410] }
  0x7a   : > { %5164 = vmatprep.subr.bf16.mxu0 %v5618_v32  ;;  %v736_v47 = vrot.slane %v728_v45, %v6437_v36  ;;  %v745_v4 = vcombine.low %v568_v17, %v6524_v61  ;;  %v617_v39 = vrot.slane %v615_v15, 7  ;;  %v637_v7 = vrot.slane %v635_v14, 7  ;;  %v4722_v20 = vld.sshfl [vmem:[%s5988_s21 + $0x40] sm:$0x13 pattern:$0x76325410] }
  0x7b   : > { %v642_v56 = vrot.slane %v640_v43, 6  ;;  %v649_v0 = vshll.u32 %v451_v38, 16  ;;  %v654_v14 = vshrl.u32 %v4720_v41, 16  ;;  %v657_v15 = vshll.u32 %v4720_v41, 16  ;;  %v5631_v41 = vld [vmem:[%s7402_s1 + $0x8] sm:$0xff]  }
  0x7c   : > { %5555 = vrot.lane.b32.xlu0 %v7447_v18, %s5877_s18  ;;  %5165 = vmatpush3.bf16.msra.mxu0 %v5618_v32  ;;  %v628_v18 = vrot.slane %v626_v49, 6  ;;  %v744_v35 = vcombine.low %v736_v47, %v6579_v1  ;;  %v753_v48 = vrot.slane %v745_v4, %v6437_v36  ;;  %v618_v61 = vor.u32 %v617_v39, %v614_v26  ;;  %v4864_v62 = vld.sshfl [vmem:[%s5988_s21 + $0x54] sm:$0x13 pattern:$0x76325410] }
  0x7d   : > { %5570 = vrot.lane.b32.xlu1 %v6333_v52, %s5879_s8  ;;  %5174 = vmatprep.subr.bf16.mxu0 %v6620_v11  ;;  %v631_v52 = vrot.slane %v629_v21, 7  ;;  %v643_v32 = vshll.u32 %v4719_v57, 16  ;;  %v7448_v1 = vpack.i.bf16 %v6342_v2, %v6340_v19  ;;  %v651_v49 = vrot.slane %v649_v0, 7 }
  0x7e   : > { %5118 = vmatprep.mubr.msk.bf16.mxu1 %vm808_vm7, %v744_v35  ;;  %v6641_v45 = vcombine.low %v753_v48, %v760_v24  ;;  %v663_v43 = vshll.u32 %v459_v28, 16  ;;  %v6645_v57 = vld.sshfl [vmem:[%s5988_s21 + $0x44] sm:$0x13 pattern:$0x76325410]  ;;  %v656_v19 = vrot.slane %v654_v14, 6  ;;  %v467_v47 = vcombine.high %v4721_v54, %v4721_v54 }
  0x7f   : > { %v632_v17 = vor.u32 %v631_v52, %v628_v18  ;;  %v645_v26 = vrot.slane %v643_v32, 7  ;;  %v659_v2 = vrot.slane %v657_v15, 7  ;;  %v5630_v24 = vld [vmem:[%s7402_s1 + $0x58] sm:$0xff]   ;;  %v7449_v28 = vld [vmem:[#allocation7_spill] sm:$0xff]  ;;  %v475_v35 = vcombine.high %v4722_v20, %v4722_v20  ;;  %v7451_v48 = vld [vmem:[#allocation5_spill] sm:$0xff] }
  0x80   : > { %5565 = vrot.lane.b32.xlu0 %v6358_v22, %s5877_s18  ;;  %v619_v22 = vrot.slane %v618_v61, 2  ;;  %5119 = vmatmul.mubr.msk.bf16.vlgmr.msra.gmra.mrb[0].mxu1 %vm808_vm7, %v6641_v45  ;;  %v7450_v4 = vpack.i.bf16 %v6351_v12, %v7449_v28  ;;  %v665_v18 = vrot.slane %v663_v43, 7  ;;  %v7452_v52 = vld [vmem:[#allocation9_spill] sm:$0xff]  ;;  %v7453_v61 = vld [vmem:[#allocation8_spill] sm:$0xff]  ;;  %v682_v43 = vshrl.u32 %v4722_v20, 16  ;;  %s270_s18 = sand.u32 1, %s5863_s25  }
  0x81   : > { %5580 = vrot.lane.b32.xlu1 %v7448_v1, %s5880_s9  ;;  %v633_v38 = vrot.slane %v632_v17, 2  ;;  %v646_v39 = vor.u32 %v645_v26, %v642_v56  ;;  %5127 = vmatpush3.bf16.msra.mxu1 %v7451_v48  ;;  %v7454_v32 = vpack.i.bf16 %v7452_v52, %v7453_v61  ;;  %v660_v0 = vor.u32 %v659_v2, %v656_v19  ;;  %v6678_v17 = vld [vmem:[%s7402_s1 + $0x20] sm:$0xff]   ;;  %s4703_s20 = sshll.u32 %s270_s18, 6 }
  0x82   : > { %v624_v21 = vsel %vm6456_vm6, %v619_v22, %v623_v37  ;;  %v4724_v37 = vld.sshfl [vmem:[%s5988_s21 + $0x48] sm:$0x13 pattern:$0x76325410]  ;;  %v483_v56 = vcombine.high %v6645_v57, %v6645_v57  ;;  %v668_v1 = vshrl.u32 %v4721_v54, 16  ;;  %v6688_v14 = vld [vmem:[%s7402_s1 + $0x60] sm:$0xff]   ;;  %5128 = vmatprep.subr.bf16.mxu1 %v5631_v41  ;;  %v7455_v59 = vpack.i.bf16 %v6372_v10, %v6360_v53 }
  0x83   : > { %5167 = vmatmul.mubr.msk.bf16.vlgmr.msra.gmra.mrb[0].mxu0 %vm808_vm7, %v1887_v30  ;;  %v638_v12 = vsel %vm6456_vm6, %v633_v38, %v637_v7  ;;  %v647_v55 = vrot.slane %v646_v39, 2  ;;  %v491_v30 = vcombine.high %v4724_v37, %v4724_v37  ;;  %v671_v7 = vshll.u32 %v4721_v54, 16  ;;  %s7220_s22 = scalar_lea.vmem [#allocation2], %s4703_s20 }
  0x84   : > { %5575 = vrot.lane.b32.xlu0 %v7450_v4, %s5878_s29  ;;  %5170 = vmatprep.mubr.msk.bf16.mxu0 %vm808_vm7, %v1904_v50  ;;  %v762_v27 = vcombine.low %v624_v21, %v638_v12  ;;  %v661_v15 = vrot.slane %v660_v0, 2  ;;  %v670_v22 = vrot.slane %v668_v1, 6  ;;  %v677_v26 = vshll.u32 %v467_v47, 16  ;;  %s4554_s14 = sshll.u32 %s7220_s22, 4  ;;  %s7311_s14 = int_to_ptr.vmem [resolvable:$true] %s4554_s14 }
  0x85   : > { %5590 = vrot.lane.b32.xlu1 %v7454_v32, %s5880_s9  ;;  %5175 = vmatpush3.bf16.msra.mxu0 %v6620_v11  ;;  %v652_v34 = vsel %vm6456_vm6, %v647_v55, %v651_v49  ;;  %v673_v11 = vrot.slane %v671_v7, 7  ;;  %v685_v54 = vshll.u32 %v4722_v20, 16  ;;  %v684_v53 = vrot.slane %v682_v43, 6 }
  0x86   : > { %5176 = vmatprep.subr.bf16.mxu0 %v5630_v24  ;;  %v770_v50 = vrot.slane %v762_v27, %v6437_v36  ;;  %5129 = vmatpush3.bf16.msra.mxu1 %v5631_v41  ;;  %v666_v38 = vsel %vm6456_vm6, %v661_v15, %v665_v18  ;;  %v679_v19 = vrot.slane %v677_v26, 7  ;;  %v691_v10 = vshll.u32 %v475_v35, 16  ;;  %v6704_v20 = vld.sshfl [vmem:[%s5988_s21] sm:$0xf pattern:$0x76325410] }
  0x87   : > { %5138 = vmatprep.subr.bf16.mxu1 %v6678_v17  ;;  %v763_v49 = vcombine.low %v652_v34, %v666_v38  ;;  %v674_v2 = vor.u32 %v673_v11, %v670_v22  ;;  %v687_v47 = vrot.slane %v685_v54, 7  ;;  %v696_v28 = vshrl.u32 %v6645_v57, 16  ;;  %v6707_v41 = vld.sshfl [vmem:[%s5988_s21 + $0x8] sm:$0xf pattern:$0x76325410] }
  0x88   : > { %5585 = vrot.lane.b32.xlu0 %v7455_v59, %s5878_s29  ;;  %v699_v4 = vshll.u32 %v6645_v57, 16  ;;  %v705_v21 = vshll.u32 %v483_v56, 16  ;;  %v710_v39 = vshrl.u32 %v4724_v37, 16  ;;  %v7456_v57 = vpack.i.bf16 %v6405_v51, %v6403_v16  ;;  %v5642_v38 = vld [vmem:[%s7402_s1 + $0x68] sm:$0xff]   ;;  %s7315_s29 = scalar_lea.sflag [#allocation3], %s270_s18 }
  0x89   : > { %5600 = vrot.lane.b32.xlu1 %v6398_v6, %s5879_s8  ;;  %5177 = vmatpush3.bf16.msra.mxu0 %v5630_v24  ;;  %v693_v6 = vrot.slane %v691_v10, 7  ;;  %v6711_v18 = vld.sshfl [vmem:[%s5988_s21 + $0x14] sm:$0xf pattern:$0x76325410]  ;;  %v777_v35 = vrot.slane %v763_v49, %v6437_v36  ;;  %v675_v24 = vrot.slane %v674_v2, 2  ;;  %v688_v48 = vor.u32 %v687_v47, %v684_v53 }
  0x8a   : > { %5186 = vmatprep.subr.bf16.mxu0 %v6688_v14  ;;  %v698_v52 = vrot.slane %v696_v28, 6  ;;  %v701_v61 = vrot.slane %v699_v4, 7  ;;  %v707_v32 = vrot.slane %v705_v21, 7  ;;  %v713_v12 = vshll.u32 %v4724_v37, 16 }
  0x8b   : > { %5171 = vmatmul.mubr.msk.bf16.gmra.mrb[4].mxu0 %vm808_vm7, %v1921_v9  ;;  %v778_v0 = vcombine.low %v770_v50, %v777_v35  ;;  %v680_v56 = vsel %vm6456_vm6, %v675_v24, %v679_v19  ;;  %v689_v1 = vrot.slane %v688_v48, 2  ;;  %v719_v55 = vshll.u32 %v491_v30, 16  ;;  %v6728_v27 = vld.sshfl [vmem:[%s5988_s21 + $0x1c] sm:$0xf pattern:$0x76325410] }
  0x8c   : > { %5595 = vrot.lane.b32.xlu0 %v6401_v5, %s5879_s8  ;;  %v712_v5 = vrot.slane %v710_v39, 6  ;;  %v702_v51 = vor.u32 %v701_v61, %v698_v52  ;;  %v715_v16 = vrot.slane %v713_v12, 7  ;;  %v4863_v7 = vld.sshfl [vmem:[%s5988_s21 + $0x50] sm:$0x13 pattern:$0x76325410]  ;;  %v7457_v60 = vpack.i.bf16 %v6411_v33, %v6409_v8  ;;  %5178 = vmatprep.mubr.msk.bf16.mxu0 %vm808_vm7, %v6641_v45 }
  0x8d   : > { %5610 = vrot.lane.b32.xlu1 %v7456_v57, %s5880_s9  ;;  %5122 = vmatprep.mubr.msk.bf16.mxu1 %vm808_vm7, %v778_v0  ;;  %v694_v9 = vsel %vm6456_vm6, %v689_v1, %v693_v6  ;;  %v721_v37 = vrot.slane %v719_v55, 7  ;;  %v6740_v26 = vld.sshfl [vmem:[%s5988_s21 + $0x58] sm:$0x13 pattern:$0x76325410]  ;;  %v918_v43 = vcombine.low %v6704_v20, %v6707_v41  ;;  %v2154_v34 = vcombine.high %v4863_v7, %v4863_v7  ;;  %v6773_v12 = vld [vmem:[%s7402_s1 + $0x70] sm:$0xff]  }
  0x8e   : > { %v703_v15 = vrot.slane %v702_v51, 2  ;;  %v716_v22 = vor.u32 %v715_v16, %v712_v5  ;;  %v779_v30 = vcombine.low %v680_v56, %v694_v9  ;;  %v6745_v59 = vld.sshfl [vmem:[%s5988_s21 + $0x5c] sm:$0x13 pattern:$0x76325410]  ;;  %v2162_v50 = vcombine.high %v4864_v62, %v4864_v62  ;;  %s5881_s8 = smov 100  }
  0x8f   : > { %v935_v19 = vcombine.low %v6711_v18, %v6728_v27  ;;  %v2170_v53 = vcombine.high %v6740_v26, %v6740_v26  ;;  %v2178_v49 = vcombine.high %v6745_v59, %v6745_v59  ;;  %v2348_v2 = vshrl.u32 %v4863_v7, 16 }
  0x90   : > { %5605 = vrot.lane.b32.xlu0 %v7457_v60, %s5880_s9  ;;  %v708_v33 = vsel %vm6456_vm6, %v703_v15, %v707_v32  ;;  %v717_v11 = vrot.slane %v716_v22, 2  ;;  %v787_v54 = vrot.slane %v779_v30, %v6437_v36  ;;  %v2351_v47 = vshll.u32 %v4863_v7, 16 }
  0x91   : > { %v2357_v41 = vshll.u32 %v2154_v34, 16  ;;  %v2362_v6 = vshrl.u32 %v4864_v62, 16  ;;  %v2365_v4 = vshll.u32 %v4864_v62, 16  ;;  %v2350_v39 = vrot.slane %v2348_v2, 6  ;;  %v7460_v62 = vld [vmem:[#allocation10_spill] sm:$0xff] }
  0x92   : > { %v722_v10 = vsel %vm6456_vm6, %v717_v11, %v721_v37  ;;  %v2353_v35 = vrot.slane %v2351_v47, 7  ;;  %v7458_v48 = vunpack.c.l.bf16 %v6363_v63  ;;  %v7459_v57 = vunpack.c.l.bf16 %v6366_v25  ;;  %v7462_v37 = vld [vmem:[#allocation11_spill] sm:$0xff] }
  0x93   : > { %v5336_v8 = vpop.permute.xlu1 %5335  ;;  %v780_v20 = vcombine.low %v708_v33, %v722_v10  ;;  %5179 = vmatmul.mubr.msk.bf16.vlgmr.msra.gmra.mrb[0].mxu0 %vm808_vm7, %v778_v0  ;;  %v2359_v45 = vrot.slane %v2357_v41, 7  ;;  %v2364_v5 = vrot.slane %v2362_v6, 6  ;;  %v2371_v1 = vshll.u32 %v2162_v50, 16  ;;  %v7466_v6 = vld [vmem:[#allocation13_spill] sm:$0xff] }
  0x94   : > { %5187 = vmatpush3.bf16.msra.mxu0 %v6688_v14  ;;  %v2354_v32 = vor.u32 %v2353_v35, %v2350_v39  ;;  %v2367_v14 = vrot.slane %v2365_v4, 7  ;;  %v2376_v55 = vshrl.u32 %v6740_v26, 16  ;;  %v7461_v60 = vunpack.c.l.bf16 %v7460_v62 }
  0x95   : > { %v794_v24 = vrot.slane %v780_v20, %v6437_v36  ;;  %5188 = vmatprep.subr.bf16.mxu0 %v5642_v38  ;;  %v7463_v15 = vunpack.c.l.bf16 %v7462_v37  ;;  %v2373_v30 = vrot.slane %v2371_v1, 7  ;;  %v7467_v4 = vunpack.c.l.bf16 %v7466_v6  ;;  %v5699_v1 = vld.sshfl [vmem:[%s5988_s21 + $0x28] sm:$0xf pattern:$0x76325410] }
  0x96   : > { %v5346_v28 = vpop.permute.xlu0 %5345  ;;  %v2355_v25 = vrot.slane %v2354_v32, 2  ;;  %v2368_v7 = vor.u32 %v2367_v14, %v2364_v5  ;;  %v2378_v34 = vrot.slane %v2376_v55, 6  ;;  %v2385_v35 = vshll.u32 %v2170_v53, 16  ;;  %v6816_v14 = vld [vmem:[%s5988_s21 + $0x40] sm:$0x3] }
  0x97   : > { %v5341_v21 = vpop.permute.xlu1 %5340  ;;  %v5677_v52 = vadd.low.f32.bf16 %v7458_v48, %v5346_v28  ;;  %v5678_v61 = vadd.high.f32.bf16 %v7459_v57, %v5346_v28  ;;  %v795_v56 = vcombine.low %v787_v54, %v794_v24  ;;  %v7464_v28 = vld [vmem:[#allocation12_spill] sm:$0xff]  ;;  %v2390_v24 = vshrl.u32 %v6745_v59, 16 }
  0x98   : > { %5189 = vmatpush3.bf16.msra.mxu0 %v5642_v38  ;;  %v2360_v11 = vsel %vm6456_vm6, %v2355_v25, %v2359_v45  ;;  %v2369_v54 = vrot.slane %v2368_v7, 2  ;;  %v7465_v20 = vunpack.c.l.bf16 %v7464_v28  ;;  %v2393_v57 = vshll.u32 %v6745_v59, 16  ;;  %v5701_v25 = vld.sshfl [vmem:[%s5988_s21 + $0x3c] sm:$0xf pattern:$0x76325410] }
  0x99   : > { %v5679_v16 = vadd.low.f32.bf16 %v5677_v52, %v5336_v8  ;;  %v5680_v63 = vadd.high.f32.bf16 %v5678_v61, %v5336_v8  ;;  %5123 = vmatmul.mubr.msk.bf16.gmra.mrb[4].mxu1 %vm808_vm7, %v795_v56  ;;  %5182 = vmatprep.mubr.msk.bf16.mxu0 %vm808_vm7, %v795_v56  ;;  %v2387_v32 = vrot.slane %v2385_v35, 7  ;;  %v2392_v53 = vrot.slane %v2390_v24, 6  ;;  %v6813_v56 = vld [vmem:[%s5988_s21 + $0x3c] sm:$0x3] }
  0x9a   : > { %v5351_v0 = vpop.permute.xlu0 %5350  ;;  %5130 = vmatprep.mubr.msk.bf16.mxu1 %vm808_vm7, %v918_v43  ;;  %5198 = vmatprep.subr.bf16.mxu0 %v6773_v12  ;;  %v2374_v47 = vsel %vm6456_vm6, %v2369_v54, %v2373_v30  ;;  %v2379_v43 = vshll.u32 %v6740_v26, 16  ;;  %v2399_v18 = vshll.u32 %v2178_v49, 16  ;;  %v5702_v7 = vld.sshfl [vmem:[%s5988_s21 + $0x44] sm:$0xf pattern:$0x76325410]  ;;  %v3461_v37 = vunpack.c.l.bf16 %v6813_v56 }
  0x9b   : > { %v5361_v51 = vpop.permute.xlu1 %5360  ;;  %v5681_v9 = vadd.low.f32.bf16 %v7461_v60, %v5351_v0  ;;  %v5682_v22 = vadd.high.f32.bf16 %v7463_v15, %v5351_v0  ;;  %v2395_v0 = vrot.slane %v2393_v57, 7  ;;  %v2459_v27 = vcombine.low %v2360_v11, %v2374_v47  ;;  %v5707_v11 = vld.sshfl [vmem:[%s5988_s21 + $0x18] sm:$0xf pattern:$0x76325410] }
  0x9c   : > { %v6784_v50 = vadd.low.f32.bf16 %v5679_v16, %v5361_v51  ;;  %v6786_v8 = vadd.high.f32.bf16 %v5680_v63, %v5361_v51  ;;  %v2381_v52 = vrot.slane %v2379_v43, 7  ;;  %v2401_v59 = vrot.slane %v2399_v18, 7  ;;  %v5708_v54 = vld.sshfl [vmem:[%s5988_s21 + $0x20] sm:$0xf pattern:$0x76325410] }
  0x9d   : > { %v5685_v10 = vadd.low.f32.bf16 %v5681_v9, %v5341_v21  ;;  %v5686_v2 = vadd.high.f32.bf16 %v5682_v22, %v5341_v21  ;;  %v5645_v21 = vld [vmem:[%s7402_s1 + $0x28] sm:$0xff]   ;;  %v2396_v40 = vor.u32 %v2395_v0, %v2392_v53  ;;  %v2467_v49 = vrot.slane %v2459_v27, %v6437_v36  ;;  %v5710_v43 = vld.sshfl [vmem:[%s5988_s21 + $0x34] sm:$0xf pattern:$0x76325410] }
  0x9e   : > { %v5356_v33 = vpop.permute.xlu0 %5355  ;;  %v2382_v5 = vor.u32 %v2381_v52, %v2378_v34  ;;  %v3462_v15 = vunpack.c.l.bf16 %v6816_v14  ;;  %v5709_v47 = vld.sshfl [vmem:[%s5988_s21 + $0x2c] sm:$0xf pattern:$0x76325410]  ;;  %v969_v24 = vcombine.low %v5701_v25, %v5702_v7  ;;  %v7468_v0 = vunpack.c.l.bf16 %v6518_v58 }
  0x9f   : > { %v5376_v38 = vpop.permute.xlu1 %5375  ;;  %v5687_v41 = vadd.low.f32.bf16 %v7465_v20, %v5356_v33  ;;  %v5688_v39 = vadd.high.f32.bf16 %v7467_v4, %v5356_v33  ;;  %v2397_v62 = vrot.slane %v2396_v40, 2  ;;  %v5715_v52 = vld.sshfl [vmem:[%s5988_s21 + $0x4] sm:$0xf pattern:$0x76325410]  ;;  %v7469_v27 = vunpack.c.l.bf16 %v6556_v44 }
  0xa0   : > { %v6801_v45 = vadd.low.f32.bf16 %v5685_v10, %v5376_v38  ;;  %v6803_v48 = vadd.high.f32.bf16 %v5686_v2, %v5376_v38  ;;  %v2383_v63 = vrot.slane %v2382_v5, 2  ;;  %v6858_v38 = vld [vmem:[%s7402_s1 + $0x30] sm:$0xff]   ;;  %v5718_v53 = vld.sshfl [vmem:[%s5988_s21 + $0x20] sm:$0xf pattern:$0x76325410]  ;;  %v2644_v58 = vcombine.low %v5709_v47, %v5710_v43 }
  0xa1   : > { %5131 = vmatmul.mubr.msk.bf16.vlgmr.msra.gmra.mrb[0].mxu1 %vm808_vm7, %v935_v19  ;;  %v5700_v19 = vld.sshfl [vmem:[%s5988_s21 + $0x30] sm:$0xf pattern:$0x76325410]  ;;  %v2402_v33 = vsel %vm6456_vm6, %v2397_v62, %v2401_v59 }
  0xa2   : > { %v5366_v26 = vpop.permute.xlu0 %5365  ;;  %5139 = vmatpush3.bf16.msra.mxu1 %v6678_v17  ;;  %v2388_v17 = vsel %vm6456_vm6, %v2383_v63, %v2387_v32  ;;  %v952_v6 = vcombine.low %v5699_v1, %v5700_v19  ;;  %v5716_v57 = vld.sshfl [vmem:[%s5988_s21 + $0xc] sm:$0xf pattern:$0x76325410] }
  0xa3   : > { %v6806_v61 = vpop.permute.xlu1 %5380  ;;  %v6821_v55 = vadd.low.f32.bf16 %v3455_v23, %v5366_v26  ;;  %v6825_v51 = vadd.high.f32.bf16 %v3456_v46, %v5366_v26  ;;  %5140 = vmatprep.subr.bf16.mxu1 %v5645_v21  ;;  %v2460_v2 = vcombine.low %v2388_v17, %v2402_v33  ;;  %v6877_v26 = vld [vmem:[%s5988_s21 + $0x48] sm:$0x3]  ;;  %v5717_v32 = vld.sshfl [vmem:[%s5988_s21 + $0x18] sm:$0xf pattern:$0x76325410]  ;;  %v1113_v7 = vcombine.low %v5715_v52, %v5716_v57 }
  0xa4   : > { %v5693_v16 = vadd.low.f32.bf16 %v6784_v50, %v6806_v61  ;;  %v5694_v31 = vadd.high.f32.bf16 %v6786_v8, %v6806_v61  ;;  %5134 = vmatprep.mubr.msk.bf16.mxu1 %vm808_vm7, %v952_v6  ;;  %v5721_v18 = vld.sshfl [vmem:[%s5988_s21 + $0x40] sm:$0xf pattern:$0x76325410]  ;;  %v3464_v63 = vunpack.c.l.bf16 %v6877_v26  ;;  %v5661_v50 = vld [vmem:[%s7402_s1 + $0x78] sm:$0xff]  }
  0xa5   : > { %v5724_v40 = vld.sshfl [vmem:[%s5988_s21 + $0x48] sm:$0xf pattern:$0x76325410] }
  0xa6   : > { %v5371_v23 = vpop.permute.xlu0 %5370  ;;  %5141 = vmatpush3.bf16.msra.mxu1 %v5645_v21  ;;  %v6873_v21 = vld [vmem:[%s5988_s21 + $0x44] sm:$0x3]  ;;  %v5726_v59 = vld.sshfl [vmem:[%s5988_s21 + $0x5c] sm:$0xf pattern:$0x76325410] }
  0xa7   : > { %v6837_v46 = vpop.permute.xlu1 %5390  ;;  %v5695_v60 = vadd.low.f32.bf16 %v5687_v41, %v5371_v23  ;;  %v5696_v9 = vadd.high.f32.bf16 %v5688_v39, %v5371_v23  ;;  %5224 = vmatprep.subr.bf16.mxu1 %v6858_v38  ;;  %v2474_v41 = vrot.slane %v2460_v2, %v6437_v36  ;;  %v5727_v44 = vld.sshfl [vmem:[%s5988_s21 + $0x2c] sm:$0xf pattern:$0x76325410] }
  0xa8   : > { %v5697_v22 = vadd.low.f32.bf16 %v6801_v45, %v6837_v46  ;;  %v5698_v30 = vadd.high.f32.bf16 %v6803_v48, %v6837_v46  ;;  %v5725_v46 = vld.sshfl [vmem:[%s5988_s21 + $0x54] sm:$0xf pattern:$0x76325410] }
  0xa9   : > { %v2475_v48 = vcombine.low %v2467_v49, %v2474_v41  ;;  %5135 = vmatmul.mubr.msk.bf16.gmra.mrb[4].mxu1 %vm808_vm7, %v969_v24  ;;  %v5730_v17 = vld.sshfl [vmem:[%s5988_s21 + $0x34] sm:$0xf pattern:$0x76325410] }
  0xaa   : > { %v6849_v34 = vpop.permute.xlu0 %5385  ;;  %v5733_v33 = vld.sshfl [vmem:[%s5988_s21 + $0x40] sm:$0xf pattern:$0x76325410]  ;;  %5142 = vmatprep.mubr.msk.bf16.mxu1 %vm808_vm7, %v1113_v7  ;;  %v5664_v24 = vld [vmem:[%s7402_s1 + $0x38] sm:$0xff]  }
  0xab   : > { %v5401_v10 = vpop.permute.xlu1 %5400  ;;  %v5703_v28 = vadd.low.f32.bf16 %v6821_v55, %v6849_v34  ;;  %v5704_v20 = vadd.high.f32.bf16 %v6825_v51, %v6849_v34  ;;  %5183 = vmatmul.mubr.msk.bf16.gmra.mrb[4].mxu0 %vm808_vm7, %v2475_v48  ;;  %v2627_v55 = vcombine.low %v5707_v11, %v5708_v54  ;;  %v3463_v51 = vunpack.c.l.bf16 %v6873_v21  ;;  %v5734_v8 = vld.sshfl [vmem:[%s5988_s21 + $0x48] sm:$0xf pattern:$0x76325410] }
  0xac   : > { %v6868_v4 = vadd.low.f32.bf16 %v5695_v60, %v5401_v10  ;;  %v6870_v39 = vadd.high.f32.bf16 %v5696_v9, %v5401_v10  ;;  %v1130_v34 = vcombine.low %v5717_v32, %v5718_v53  ;;  %v4919_v61 = vld.sshfl [vmem:[%s5988_s21 + $0x18] sm:$0x13 pattern:$0x76325410]  ;;  %v2678_v11 = vcombine.low %v5725_v46, %v5726_v59 }
  0xad   : > { %5190 = vmatprep.mubr.msk.bf16.mxu0 %vm808_vm7, %v2627_v55  ;;  %v2937_v47 = vshrl.u32 %v4919_v61, 16  ;;  %v4921_v41 = vld.sshfl [vmem:[%s5988_s21 + $0x20] sm:$0x13 pattern:$0x76325410]  ;;  %v2815_v6 = vcombine.high %v4919_v61, %v4919_v61  ;;  %v1164_v48 = vcombine.low %v5733_v33, %v5734_v8 }
  0xae   : > { %v5396_v35 = vpop.permute.xlu0 %5395  ;;  %v6957_v52 = vld.sshfl [vmem:[%s5988_s21 + $0x24] sm:$0x13 pattern:$0x76325410]  ;;  %v2831_v57 = vcombine.high %v4921_v41, %v4921_v41 }
  0xaf   : > { %v5411_v45 = vpop.permute.xlu1 %5410  ;;  %v6886_v5 = vadd.low.f32.bf16 %v3457_v42, %v5396_v35  ;;  %v6890_v1 = vadd.high.f32.bf16 %v7468_v0, %v5396_v35  ;;  %v2839_v0 = vcombine.high %v6957_v52, %v6957_v52 }
  0xb0   : > { %v6897_v19 = vadd.low.f32.bf16 %v7469_v27, %v5411_v45  ;;  %v6901_v42 = vadd.high.f32.bf16 %v7470_v29, %v5411_v45 }
  0xb1   : > { %5143 = vmatmul.mubr.msk.bf16.vlgmr.msra.gmra.mrb[0].mxu1 %vm808_vm7, %v1130_v34  ;;  %v2965_v34 = vshrl.u32 %v4921_v41, 16 }
  0xb2   : > { %v5406_v23 = vpop.permute.xlu0 %5405  ;;  %5226 = vmatpush3.bf16.msra.mxu1 %v6858_v38 }
  0xb3   : > { %v5421_v25 = vpop.permute.xlu1 %5420  ;;  %v6912_v3 = vadd.low.f32.bf16 %v5693_v16, %v5406_v23  ;;  %v6917_v49 = vadd.high.f32.bf16 %v5694_v31, %v5406_v23  ;;  %v2661_v31 = vcombine.low %v5721_v18, %v5724_v40  ;;  %5191 = vmatmul.mubr.msk.bf16.vlgmr.msra.gmra.mrb[0].mxu0 %vm808_vm7, %v2644_v58  ;;  %5225 = vmatprep.subr.bf16.mxu1 %v5664_v24  ;;  %v2946_v18 = vshll.u32 %v2815_v6, 16 }
  0xb4   : > { %v6920_v62 = vadd.low.f32.bf16 %v5697_v22, %v5421_v25  ;;  %v6922_v60 = vadd.high.f32.bf16 %v5698_v30, %v5421_v25  ;;  %5199 = vmatpush3.bf16.msra.mxu0 %v6773_v12 }
  0xb5   : > { %5194 = vmatprep.mubr.msk.bf16.mxu0 %vm808_vm7, %v2661_v31  ;;  %5200 = vmatprep.subr.bf16.mxu0 %v5661_v50  ;;  %v2948_v58 = vrot.slane %v2946_v18, 7 }
  0xb6   : > { %v5416_v9 = vpop.permute.xlu0 %5415  ;;  %5227 = vmatpush3.bf16.msra.mxu1 %v5664_v24 }
  0xb7   : > { %v6928_v16 = vpop.permute.xlu1 %5430  ;;  %v6934_v22 = vadd.low.f32.bf16 %v5703_v28, %v5416_v9  ;;  %v6936_v30 = vadd.high.f32.bf16 %v5704_v20, %v5416_v9  ;;  %v1147_v28 = vcombine.low %v5727_v44, %v5730_v17  ;;  %v4920_v20 = vld.sshfl [vmem:[%s5988_s21 + $0x1c] sm:$0x13 pattern:$0x76325410] }
  0xb8   : > { %v5731_v54 = vadd.low.f32.bf16 %v6868_v4, %v6928_v16  ;;  %v5732_v10 = vadd.high.f32.bf16 %v6870_v39, %v6928_v16  ;;  %v2823_v35 = vcombine.high %v4920_v20, %v4920_v20  ;;  %5201 = vmatpush3.bf16.msra.mxu0 %v5661_v50  ;;  %v2951_v27 = vshrl.u32 %v4920_v20, 16 }
  0xb9   : > { %5146 = vmatprep.mubr.msk.bf16.mxu1 %vm808_vm7, %v1147_v28  ;;  %v2954_v29 = vshll.u32 %v4920_v20, 16  ;;  %v2974_v28 = vshll.u32 %v2831_v57, 16 }
  0xba   : > { %v5426_v2 = vpop.permute.xlu0 %5425  ;;  %5147 = vmatmul.mubr.msk.bf16.gmra.mrb[4].mxu1 %vm808_vm7, %v1164_v48  ;;  %v2953_v59 = vrot.slane %v2951_v27, 6  ;;  %v2960_v9 = vshll.u32 %v2823_v35, 16  ;;  %v2979_v35 = vshrl.u32 %v6957_v52, 16 }
  0xbb   : > { %v6945_v43 = vpop.permute.xlu1 %5440  ;;  %v5735_v45 = vadd.low.f32.bf16 %v6886_v5, %v5426_v2  ;;  %v5736_v12 = vadd.high.f32.bf16 %v6890_v1, %v5426_v2  ;;  %v2939_v5 = vrot.slane %v2937_v47, 6  ;;  %v2940_v1 = vshll.u32 %v4919_v61, 16  ;;  %5195 = vmatmul.mubr.msk.bf16.gmra.mrb[4].mxu0 %vm808_vm7, %v2678_v11 }
  0xbc   : > { %v5737_v38 = vadd.low.f32.bf16 %v6897_v19, %v6945_v43  ;;  %v5738_v32 = vadd.high.f32.bf16 %v6901_v42, %v6945_v43  ;;  %v2956_v44 = vrot.slane %v2954_v29, 7  ;;  %v2967_v11 = vrot.slane %v2965_v34, 6 }
  0xbd   : > { %v2942_v42 = vrot.slane %v2940_v1, 7  ;;  %v2968_v43 = vshll.u32 %v4921_v41, 16  ;;  %v2976_v48 = vrot.slane %v2974_v28, 7  ;;  %v2982_v41 = vshll.u32 %v6957_v52, 16 }
  0xbe   : > { %v5436_v53 = vpop.permute.xlu0 %5435  ;;  %v2981_v57 = vrot.slane %v2979_v35, 6 }
  0xbf   : > { %v6965_v55 = vpop.permute.xlu1 %5450  ;;  %v5739_v19 = vadd.low.f32.bf16 %v6912_v3, %v5436_v53  ;;  %v5740_v23 = vadd.high.f32.bf16 %v6917_v49, %v5436_v53  ;;  %v2943_v17 = vor.u32 %v2942_v42, %v2939_v5  ;;  %v2957_v3 = vor.u32 %v2956_v44, %v2953_v59  ;;  %v4924_v42 = vld.sshfl [vmem:[%s5988_s21 + $0x30] sm:$0x13 pattern:$0x76325410] }
  0xc0   : > { %v5741_v40 = vadd.low.f32.bf16 %v6920_v62, %v6965_v55  ;;  %v5742_v25 = vadd.high.f32.bf16 %v6922_v60, %v6965_v55  ;;  %v2962_v62 = vrot.slane %v2960_v9, 7  ;;  %v2970_v6 = vrot.slane %v2968_v43, 7 }
  0xc1   : > { %v2944_v50 = vrot.slane %v2943_v17, 2  ;;  %v2958_v31 = vrot.slane %v2957_v3, 2  ;;  %v2984_v1 = vrot.slane %v2982_v41, 7  ;;  %v2855_v9 = vcombine.high %v4924_v42, %v4924_v42 }
  0xc2   : > { %v6975_v46 = vpop.permute.xlu0 %5445  ;;  %v2971_v5 = vor.u32 %v2970_v6, %v2967_v11  ;;  %v4925_v17 = vld.sshfl [vmem:[%s5988_s21 + $0x34] sm:$0x13 pattern:$0x76325410] }
  0xc3   : > { %v5461_v7 = vpop.permute.xlu1 %5460  ;;  %v5743_v49 = vadd.low.f32.bf16 %v6934_v22, %v6975_v46  ;;  %v5744_v33 = vadd.high.f32.bf16 %v6936_v30, %v6975_v46  ;;  %v2949_v47 = vsel %vm6456_vm6, %v2944_v50, %v2948_v58  ;;  %v2963_v22 = vsel %vm6456_vm6, %v2958_v31, %v2962_v62 }
  0xc4   : > { %v6981_v8 = vadd.low.f32.bf16 %v5735_v45, %v5461_v7  ;;  %v6983_v60 = vadd.high.f32.bf16 %v5736_v12, %v5461_v7  ;;  %v3165_v16 = vcombine.low %v2949_v47, %v2963_v22 }
  0xc6   : > { %v5456_v61 = vpop.permute.xlu0 %5455  ;;  %v3173_v7 = vrot.slane %v3165_v16, %v6437_v36 }
  0xc7   : > { %v5471_v2 = vpop.permute.xlu1 %5470  ;;  %v6991_v30 = vadd.low.f32.bf16 %v3461_v37, %v5456_v61  ;;  %v6995_v20 = vadd.high.f32.bf16 %v3462_v15, %v5456_v61  ;;  %v2972_v15 = vrot.slane %v2971_v5, 2  ;;  %v3007_v5 = vshrl.u32 %v4924_v42, 16 }
  0xc8   : > { %v5749_v24 = vadd.low.f32.bf16 %v5739_v19, %v5471_v2  ;;  %v5750_v45 = vadd.high.f32.bf16 %v5740_v23, %v5471_v2  ;;  %v2988_v19 = vshll.u32 %v2839_v0, 16 }
  0xc9   : > { %v2977_v4 = vsel %vm6456_vm6, %v2972_v15, %v2976_v48  ;;  %v3009_v15 = vrot.slane %v3007_v5, 6 }
  0xca   : > { %v5466_v12 = vpop.permute.xlu0 %5465  ;;  %v4329_v55 = vmul.f32 0.125, %v5749_v24  ;;  %v4330_v56 = vmul.f32 0.125, %v5750_v45  ;;  %v2990_v39 = vrot.slane %v2988_v19, 7 }
  0xcb   : > { %v5481_v53 = vpop.permute.xlu1 %5480  ;;  %v7002_v14 = vadd.low.f32.bf16 %v5731_v54, %v5466_v12  ;;  %v7007_v37 = vadd.high.f32.bf16 %v5732_v10, %v5466_v12  ;;  %v2985_v54 = vor.u32 %v2984_v1, %v2981_v57  ;;  %v4923_v10 = vld.sshfl [vmem:[%s5988_s21 + $0x2c] sm:$0x13 pattern:$0x76325410]  ;;  %v3021_v1 = vshrl.u32 %v4925_v17, 16 }
  0xcc   : > { %v7009_v18 = vadd.low.f32.bf16 %v5737_v38, %v5481_v53  ;;  %v7011_v52 = vadd.high.f32.bf16 %v5738_v32, %v5481_v53  ;;  %v4369_v29 = vcombine.low %v4329_v55, %v4330_v56  ;;  %v2847_v58 = vcombine.high %v4923_v10, %v4923_v10 }
  0xcd   : > { %v2986_v0 = vrot.slane %v2985_v54, 2  ;;  %v2993_v47 = vshrl.u32 %v4923_v10, 16  ;;  %v3010_v55 = vshll.u32 %v4924_v42, 16 }
  0xce   : > { %v5476_v27 = vpop.permute.xlu0 %5475  ;;  %4377 = vrot.lane.b32.xlu0 %v4369_v29, %s5881_s8  ;;  %v3002_v28 = vshll.u32 %v2847_v58, 16 }
  0xcf   : > { %v5491_v23 = vpop.permute.xlu1 %5490  ;;  %v7019_v38 = vadd.low.f32.bf16 %v3463_v51, %v5476_v27  ;;  %v7023_v32 = vadd.high.f32.bf16 %v3464_v63, %v5476_v27  ;;  %v2991_v21 = vsel %vm6456_vm6, %v2986_v0, %v2990_v39  ;;  %v2863_v51 = vcombine.high %v4925_v17, %v4925_v17  ;;  %v4926_v63 = vld.sshfl [vmem:[%s5988_s21 + $0x38] sm:$0x13 pattern:$0x76325410] }
  0xd0   : > { %v5757_v46 = vadd.low.f32.bf16 %v5741_v40, %v5491_v23  ;;  %v5758_v59 = vadd.high.f32.bf16 %v5742_v25, %v5491_v23  ;;  %v3166_v40 = vcombine.low %v2977_v4, %v2991_v21  ;;  %v2871_v25 = vcombine.high %v4926_v63, %v4926_v63 }
  0xd1   : > { %v3004_v53 = vrot.slane %v3002_v28, 7  ;;  %v3024_v27 = vshll.u32 %v4925_v17, 16  ;;  %v3012_v4 = vrot.slane %v3010_v55, 7  ;;  %v3023_v39 = vrot.slane %v3021_v1, 6 }
  0xd2   : > { %v5486_v44 = vpop.permute.xlu0 %5485  ;;  %v4331_v26 = vmul.f32 0.125, %v5757_v46  ;;  %v4332_v34 = vmul.f32 0.125, %v5758_v59  ;;  %v3180_v22 = vrot.slane %v3166_v40, %v6437_v36  ;;  %v3035_v46 = vshrl.u32 %v4926_v63, 16 }
  0xd3   : > { %v7028_v3 = vpop.permute.xlu1 %5500  ;;  %v7033_v50 = vadd.low.f32.bf16 %v5743_v49, %v5486_v44  ;;  %v7035_v62 = vadd.high.f32.bf16 %v5744_v33, %v5486_v44  ;;  %v2996_v49 = vshll.u32 %v4923_v10, 16  ;;  %v2995_v33 = vrot.slane %v2993_v47, 6 }
  0xd4   : > { %v5761_v61 = vadd.low.f32.bf16 %v6981_v8, %v7028_v3  ;;  %v5762_v31 = vadd.high.f32.bf16 %v6983_v60, %v7028_v3  ;;  %v4370_v2 = vcombine.low %v4331_v26, %v4332_v34  ;;  %v3181_v24 = vcombine.low %v3173_v7, %v3180_v22 }
  0xd5   : > { %v2998_v45 = vrot.slane %v2996_v49, 7  ;;  %v3026_v16 = vrot.slane %v3024_v27, 7  ;;  %v3030_v10 = vshll.u32 %v2863_v51, 16  ;;  %v3013_v58 = vor.u32 %v3012_v4, %v3009_v15 }
  0xd6   : > { %v7041_v11 = vpop.permute.xlu0 %5495  ;;  %4379 = vrot.lane.b32.xlu1 %v4370_v2, %s5881_s8  ;;  %5202 = vmatprep.mubr.msk.bf16.mxu0 %vm808_vm7, %v3181_v24  ;;  %v3038_v59 = vshll.u32 %v4926_v63, 16  ;;  %v3037_v26 = vrot.slane %v3035_v46, 6 }
  0xd7   : > { %v7043_v43 = vpop.permute.xlu1 %5510  ;;  %v5763_v6 = vadd.low.f32.bf16 %v6991_v30, %v7041_v11  ;;  %v5764_v35 = vadd.high.f32.bf16 %v6995_v20, %v7041_v11  ;;  %v2999_v57 = vor.u32 %v2998_v45, %v2995_v33  ;;  %v3016_v20 = vshll.u32 %v2855_v9, 16  ;;  %v4927_v45 = vld.sshfl [vmem:[%s5988_s21 + $0x40] sm:$0x13 pattern:$0x76325410] }
  0xd8   : > { %v5765_v12 = vadd.low.f32.bf16 %v7019_v38, %v7043_v43  ;;  %v5766_v48 = vadd.high.f32.bf16 %v7023_v32, %v7043_v43  ;;  %v3027_v7 = vor.u32 %v3026_v16, %v3023_v39  ;;  %v3032_v17 = vrot.slane %v3030_v10, 7  ;;  %v4930_v39 = vld.sshfl [vmem:[%s5988_s21 + $0x4c] sm:$0x13 pattern:$0x76325410] }
  0xd9   : > { %v3000_v23 = vrot.slane %v2999_v57, 2  ;;  %v3018_v54 = vrot.slane %v3016_v20, 7  ;;  %v3044_v9 = vshll.u32 %v2871_v25, 16  ;;  %v3014_v21 = vrot.slane %v3013_v58, 2 }
  0xda   : > { %v7055_v41 = vpop.permute.xlu0 %5505  ;;  %v3040_v34 = vrot.slane %v3038_v59, 7  ;;  %v3028_v40 = vrot.slane %v3027_v7, 2  ;;  %v4928_v57 = vld.sshfl [vmem:[%s5988_s21 + $0x44] sm:$0x13 pattern:$0x76325410]  ;;  %v2879_v1 = vcombine.high %v4927_v45, %v4927_v45 }
  0xdb   : > { %v7058_v56 = vpop.permute.xlu1 %5520  ;;  %v5767_v29 = vadd.low.f32.bf16 %v7002_v14, %v7055_v41  ;;  %v5768_v19 = vadd.high.f32.bf16 %v7007_v37, %v7055_v41  ;;  %v3005_v42 = vsel %vm6456_vm6, %v3000_v23, %v3004_v53  ;;  %v3046_v2 = vrot.slane %v3044_v9, 7  ;;  %v4929_v20 = vld.sshfl [vmem:[%s5988_s21 + $0x48] sm:$0x13 pattern:$0x76325410] }
  0xdc   : > { %v5769_v51 = vadd.high.f32.bf16 %v7035_v62, %v7058_v56  ;;  %v3019_v22 = vsel %vm6456_vm6, %v3014_v21, %v3018_v54  ;;  %v3041_v63 = vor.u32 %v3040_v34, %v3037_v26  ;;  %v5770_v49 = vadd.low.f32.bf16 %v7033_v50, %v7058_v56  ;;  %v4931_v21 = vld.sshfl [vmem:[%s5988_s21 + $0x54] sm:$0x13 pattern:$0x76325410] }
  0xdd   : > { %v3033_v25 = vsel %vm6456_vm6, %v3028_v40, %v3032_v17  ;;  %v3182_v28 = vcombine.low %v3005_v42, %v3019_v22  ;;  %v2887_v16 = vcombine.high %v4928_v57, %v4928_v57  ;;  %v2903_v42 = vcombine.high %v4930_v39, %v4930_v39 }
  0xde   : > { %v7064_v0 = vpop.permute.xlu0 %5515  ;;  %v3042_v53 = vrot.slane %v3041_v63, 2  ;;  %v3049_v46 = vshrl.u32 %v4927_v45, 16  ;;  %v3052_v59 = vshll.u32 %v4927_v45, 16  ;;  %v3058_v8 = vshll.u32 %v2879_v1, 16 }
  0xdf   : > { %v5531_v44 = vpop.permute.xlu1 %5530  ;;  %v5771_v24 = vadd.high.f32.bf16 %v7011_v52, %v7064_v0  ;;  %v3190_v55 = vrot.slane %v3182_v28, %v6437_v36  ;;  %v3063_v3 = vshrl.u32 %v4928_v57, 16  ;;  %v3077_v7 = vshrl.u32 %v4929_v20, 16  ;;  %v4932_v28 = vld.sshfl [vmem:[%s5988_s21 + $0x58] sm:$0x13 pattern:$0x76325410] }
  0xe0   : > { %v7088_v15 = vadd.high.f32.bf16 %v5762_v31, %v5531_v44  ;;  %v3047_v23 = vsel %vm6456_vm6, %v3042_v53, %v3046_v2  ;;  %v7098_v4 = vadd.low.f32.bf16 %v5761_v61, %v5531_v44  ;;  %v2895_v31 = vcombine.high %v4929_v20, %v4929_v20  ;;  %v4933_v1 = vld.sshfl [vmem:[%s5988_s21 + $0x5c] sm:$0x13 pattern:$0x76325410] }
  0xe1   : > { %v3183_v10 = vcombine.low %v3033_v25, %v3047_v23  ;;  %v3072_v44 = vshll.u32 %v2887_v16, 16  ;;  %v3051_v30 = vrot.slane %v3049_v46, 6  ;;  %v3054_v11 = vrot.slane %v3052_v59, 7 }
  0xe2   : > { %v5526_v47 = vpop.permute.xlu0 %5525  ;;  %v3065_v9 = vrot.slane %v3063_v3, 6  ;;  %v3079_v2 = vrot.slane %v3077_v7, 6  ;;  %v3080_v22 = vshll.u32 %v4929_v20, 16  ;;  %v3086_v63 = vshll.u32 %v2895_v31, 16 }
  0xe3   : > { %v7074_v33 = vpop.permute.xlu1 %5540  ;;  %v7100_v54 = vadd.high.f32.bf16 %v5764_v35, %v5526_v47  ;;  %v7106_v60 = vadd.low.f32.bf16 %v5763_v6, %v5526_v47  ;;  %v3197_v61 = vrot.slane %v3183_v10, %v6437_v36  ;;  %v3066_v35 = vshll.u32 %v4928_v57, 16  ;;  %v4934_v23 = vld.sshfl [vmem:[%s5988_s21 + $0x60] sm:$0x13 pattern:$0x76325410]  ;;  %s5882_s21 = smov [#allocation2]  }
  0xe4   : > { %v3060_v6 = vrot.slane %v3058_v8, 7  ;;  %v3074_v40 = vrot.slane %v3072_v44, 7  ;;  %v3055_v47 = vor.u32 %v3054_v11, %v3051_v30  ;;  %v3091_v25 = vshrl.u32 %v4930_v39, 16  ;;  %s5813_s9 = sshll.u32 %s5882_s21, 4  ;;  %s5814_s9 = int_to_ptr.vmem [resolvable:$false] %s5813_s9 }
  0xe5   : > { %v3198_v26 = vcombine.low %v3190_v55, %v3197_v61  ;;  %v3068_v34 = vrot.slane %v3066_v35, 7  ;;  %v3094_v53 = vshll.u32 %v4930_v39, 16  ;;  %v3100_v57 = vshll.u32 %v2903_v42, 16  ;;  %s5815_s20 = scalar_lea.vmem %s5814_s9, 2048  ;;  %p5816_p0 = scmp.lt.s32.totalorder %s7311_s14, %s5814_s9 }
  0xe6   : > { %v7091_v27 = vpop.permute.xlu0 %5535  ;;  %v2911_v16 = vcombine.high %v4931_v21, %v4931_v21  ;;  %v3056_v55 = vrot.slane %v3055_v47, 2  ;;  %v3082_v46 = vrot.slane %v3080_v22, 7  ;;  %v3088_v59 = vrot.slane %v3086_v63, 7 }
  0xe7   : > { %v7108_v58 = vpop.permute.xlu1 %5550  ;;  %5203 = vmatmul.mubr.msk.bf16.vlgmr.msra.gmra.mrb[0].mxu0 %vm808_vm7, %v3198_v26  ;;  %5158 = vmatprep.mubr.msk.bf16.mxu1 %vm808_vm7, %v3198_v26  ;;  %v3069_v45 = vor.u32 %v3068_v34, %v3065_v9  ;;  %v3093_v8 = vrot.slane %v3091_v25, 6  ;;  %v3096_v3 = vrot.slane %v3094_v53, 7  ;;  %v3102_v61 = vrot.slane %v3100_v57, 7 }
  0xe8   : > { %v2919_v35 = vcombine.high %v4932_v28, %v4932_v28  ;;  %v3061_v44 = vsel %vm6456_vm6, %v3056_v55, %v3060_v6  ;;  %v3083_v39 = vor.u32 %v3082_v46, %v3079_v2  ;;  %v2927_v42 = vcombine.high %v4933_v1, %v4933_v1 }
  0xe9   : > { %v3070_v31 = vrot.slane %v3069_v45, 2  ;;  %v2935_v7 = vcombine.high %v4934_v23, %v4934_v23  ;;  %v3097_v11 = vor.u32 %v3096_v3, %v3093_v8  ;;  %v3105_v9 = vshrl.u32 %v4931_v21, 16 }
  0xea   : > { %v7111_v17 = vpop.permute.xlu0 %5545  ;;  %v3108_v26 = vshll.u32 %v4931_v21, 16  ;;  %v3084_v34 = vrot.slane %v3083_v39, 2  ;;  %v3114_v22 = vshll.u32 %v2911_v16, 16  ;;  %v3119_v63 = vshrl.u32 %v4932_v28, 16 }
  0xeb   : > { %v7119_v10 = vpop.permute.xlu1 %5560  ;;  %v3075_v30 = vsel %vm6456_vm6, %v3070_v31, %v3074_v40  ;;  %v3098_v25 = vrot.slane %v3097_v11, 2  ;;  %v3107_v45 = vrot.slane %v3105_v9, 6  ;;  %v3122_v57 = vshll.u32 %v4932_v28, 16 }
  0xec   : > { %v3199_v47 = vcombine.low %v3061_v44, %v3075_v30  ;;  %v3110_v53 = vrot.slane %v3108_v26, 7  ;;  %v3089_v6 = vsel %vm6456_vm6, %v3084_v34, %v3088_v59  ;;  %v3116_v55 = vrot.slane %v3114_v22, 7 }
  0xed   : > { %v3121_v40 = vrot.slane %v3119_v63, 6  ;;  %v3103_v21 = vsel %vm6456_vm6, %v3098_v25, %v3102_v61  ;;  %v3124_v8 = vrot.slane %v3122_v57, 7  ;;  %v3128_v31 = vshll.u32 %v2919_v35, 16 }
  0xee   : > { %v7121_v20 = vpop.permute.xlu0 %5555  ;;  %v3207_v2 = vrot.slane %v3199_v47, %v6437_v36  ;;  %v3111_v16 = vor.u32 %v3110_v53, %v3107_v45  ;;  %v3200_v3 = vcombine.low %v3089_v6, %v3103_v21  ;;  %v3133_v44 = vshrl.u32 %v4933_v1, 16 }
  0xef   : > { %v7127_v5 = vpop.permute.xlu1 %5570  ;;  %v3136_v28 = vshll.u32 %v4933_v1, 16  ;;  %v3142_v39 = vshll.u32 %v2927_v42, 16  ;;  %v3125_v11 = vor.u32 %v3124_v8, %v3121_v40  ;;  %v3130_v9 = vrot.slane %v3128_v31, 7 }
  0xf0   : > { %v3112_v30 = vrot.slane %v3111_v16, 2  ;;  %v3147_v59 = vshrl.u32 %v4934_v23, 16  ;;  %v3214_v26 = vrot.slane %v3200_v3, %v6437_v36  ;;  %v3135_v34 = vrot.slane %v3133_v44, 6 }
  0xf1   : > { %v3138_v47 = vrot.slane %v3136_v28, 7  ;;  %v3144_v22 = vrot.slane %v3142_v39, 7  ;;  %v3126_v61 = vrot.slane %v3125_v11, 2  ;;  %v3150_v45 = vshll.u32 %v4934_v23, 16 }
  0xf2   : > { %v7132_v46 = vpop.permute.xlu0 %5565  ;;  %v3117_v63 = vsel %vm6456_vm6, %v3112_v30, %v3116_v55  ;;  %v3149_v25 = vrot.slane %v3147_v59, 6  ;;  %v3215_v53 = vcombine.low %v3207_v2, %v3214_v26  ;;  %v3156_v1 = vshll.u32 %v2935_v7, 16 }
  0xf3   : > { %v5581_v35 = vpop.permute.xlu1 %5580  ;;  %v3139_v57 = vor.u32 %v3138_v47, %v3135_v34  ;;  %v3131_v6 = vsel %vm6456_vm6, %v3126_v61, %v3130_v9  ;;  %v3152_v40 = vrot.slane %v3150_v45, 7  ;;  %v5777_v23 = vadd.high.f32.bf16 %v5766_v48, %v7074_v33 }
  0xf4   : > { %5206 = vmatprep.mubr.msk.bf16.mxu0 %vm808_vm7, %v3215_v53  ;;  %5159 = vmatmul.mubr.msk.bf16.vlgmr.msra.gmra.mrb[4].mxu1 %vm808_vm7, %v3215_v53  ;;  %v3158_v16 = vrot.slane %v3156_v1, 7  ;;  %v3216_v8 = vcombine.low %v3117_v63, %v3131_v6  ;;  %v5778_v7 = vadd.low.f32.bf16 %v5765_v12, %v7074_v33  ;;  %v5779_v55 = vadd.high.f32.bf16 %v5768_v19, %v7091_v27 }
  0xf5   : > { %v3140_v21 = vrot.slane %v3139_v57, 2  ;;  %v3153_v2 = vor.u32 %v3152_v40, %v3149_v25  ;;  %v5780_v32 = vadd.low.f32.bf16 %v5767_v29, %v7091_v27  ;;  %v5781_v38 = vadd.low.f32.bf16 %v5770_v49, %v7108_v58 }
  0xf6   : > { %v5576_v42 = vpop.permute.xlu0 %5575  ;;  %v3224_v3 = vrot.slane %v3216_v8, %v6437_v36  ;;  %v4334_v48 = vmul.f32 0.125, %v5779_v55  ;;  %v5782_v37 = vadd.high.f32.bf16 %v5769_v51, %v7108_v58  ;;  %v5783_v14 = vadd.high.f32.bf16 %v5771_v24, %v7111_v17 }
  0xf7   : > { %v3145_v31 = vsel %vm6456_vm6, %v3140_v21, %v3144_v22  ;;  %v3154_v44 = vrot.slane %v3153_v2, 2  ;;  %v5591_v28 = vpop.permute.xlu1 %5590  ;;  %v4333_v19 = vmul.f32 0.125, %v5780_v32  ;;  %v4335_v29 = vmul.f32 0.125, %v5781_v38 }
  0xf8   : > { %v4336_v33 = vmul.f32 0.125, %v5782_v37  ;;  %v7471_v50 = vadd.low.f32.bf16 %v7009_v18, %v7064_v0  ;;  %v5785_v62 = vadd.low.f32.bf16 %v7098_v4, %v7119_v10  ;;  %v5786_v13 = vadd.high.f32.bf16 %v7088_v15, %v7119_v10 }
  0xf9   : > { %v3159_v12 = vsel %vm6456_vm6, %v3154_v44, %v3158_v16  ;;  %v4371_v51 = vcombine.low %v4333_v19, %v4334_v48  ;;  %v5787_v52 = vadd.low.f32.bf16 %v7106_v60, %v7121_v20  ;;  %v5788_v24 = vadd.high.f32.bf16 %v7100_v54, %v7121_v20 }
  0xfa   : > { %v5586_v43 = vpop.permute.xlu0 %5585  ;;  %v3217_v41 = vcombine.low %v3145_v31, %v3159_v12  ;;  %v5784_v49 = vadd.low.f32.bf16 %v7471_v50, %v7111_v17  ;;  %v4372_v27 = vcombine.low %v4335_v29, %v4336_v33  ;;  %v5790_v0 = vadd.high.f32.bf16 %v5783_v14, %v7127_v5 }
  0xfb   : > { %v5601_v58 = vpop.permute.xlu1 %5600  ;;  %4381 = vrot.lane.b32.xlu0 %v4371_v51, %s5881_s8  ;;  %v5792_v15 = vadd.low.f32.bf16 %v5778_v7, %v7132_v46  ;;  %v5793_v60 = vadd.low.f32.bf16 %v5785_v62, %v5581_v35  ;;  %v5794_v54 = vadd.high.f32.bf16 %v5786_v13, %v5581_v35  ;;  %v5795_v17 = vadd.high.f32.bf16 %v5788_v24, %v5576_v42 }
  0xfc   : > { %v3231_v56 = vrot.slane %v3217_v41, %v6437_v36  ;;  %v5789_v18 = vadd.low.f32.bf16 %v5784_v49, %v7127_v5  ;;  %4383 = vrot.lane.b32.xlu1 %v4372_v27, %s5881_s8  ;;  %v5791_v36 = vadd.high.f32.bf16 %v5777_v23, %v7132_v46  ;;  %v5796_v10 = vadd.low.f32.bf16 %v5787_v52, %v5576_v42  ;;  %v4345_v46 = vld [vmem:[%s7403_s2] sm:$0xf] }
  0xfd   : > { %v5798_v30 = vadd.high.f32.bf16 %v5790_v0, %v5591_v28  ;;  %v4337_v11 = vmul.f32 0.125, %v5793_v60  ;;  %v4338_v9 = vmul.f32 0.125, %v5794_v54  ;;  %v5800_v47 = vadd.low.f32.bf16 %v5792_v15, %v5586_v43  ;;  %5210 = vmatprep.subr.msk.mxu1 %vm4409_vm8, %v4345_v46 }
  0xfe   : > { %v3232_v39 = vcombine.low %v3224_v3, %v3231_v56  ;;  %v5596_v4 = vpop.permute.xlu0 %5595  ;;  %v5797_v20 = vadd.low.f32.bf16 %v5789_v18, %v5591_v28  ;;  %v5799_v59 = vadd.high.f32.bf16 %v5791_v36, %v5586_v43  ;;  %5211 = vmatpush3.msk.msra.mxu1 %vm4409_vm8, %v4345_v46 }
  0xff   : > { %v5611_v26 = vpop.permute.xlu1 %5610  ;;  %v4340_v34 = vmul.f32 0.125, %v5798_v30  ;;  %v4373_v61 = vcombine.low %v4337_v11, %v4338_v9  ;;  %v5802_v25 = vadd.low.f32.bf16 %v5800_v47, %v5601_v58  ;;  %v5803_v35 = vadd.low.f32.bf16 %v5796_v10, %v5596_v4 }
 0x100   : > { %5207 = vmatmul.mubr.msk.bf16.gmra.mrb[4].mxu0 %vm808_vm7, %v3232_v39  ;;  %v4339_v5 = vmul.f32 0.125, %v5797_v20  ;;  %v5801_v63 = vadd.high.f32.bf16 %v5799_v59, %v5601_v58  ;;  %v5804_v53 = vadd.high.f32.bf16 %v5795_v17, %v5596_v4 }
 0x101   : > { %4385 = vrot.lane.b32.xlu0 %v4373_v61, %s5881_s8  ;;  %v5805_v57 = vadd.low.f32.bf16 %v5802_v25, %v5611_v26 }
 0x102   : > { %v5606_v22 = vpop.permute.xlu0 %5605  ;;  %v4374_v45 = vcombine.low %v4339_v5, %v4340_v34  ;;  %v5806_v1 = vadd.high.f32.bf16 %v5801_v63, %v5611_v26 }
 0x103   : > { %v5807_v42 = vadd.low.f32.bf16 %v5803_v35, %v5606_v22  ;;  %v5808_v6 = vadd.high.f32.bf16 %v5804_v53, %v5606_v22  ;;  %v4343_v40 = vmul.f32 0.125, %v5805_v57 }
 0x104   : > { %4387 = vrot.lane.b32.xlu1 %v4374_v45, %s5881_s8  ;;  %v4344_v21 = vmul.f32 0.125, %v5806_v1 }
 0x105   : > { %v4341_v16 = vmul.f32 0.125, %v5807_v42  ;;  %v4342_v8 = vmul.f32 0.125, %v5808_v6 }
 0x106   : > { %v4376_v23 = vcombine.low %v4343_v40, %v4344_v21 }
 0x107   : > { %v4375_v2 = vcombine.low %v4341_v16, %v4342_v8 }
 0x108   : > { %4391 = vrot.lane.b32.xlu1 %v4376_v23, %s5881_s8 }
 0x109   : > { %4389 = vrot.lane.b32.xlu0 %v4375_v2, %s5881_s8  ;;  %s5809_s8 = scalar_lea.vmem %s7311_s14, 1024 }
 0x10a   : > { %p5810_p11 = scmp.ne.s32.totalorder %s7311_s14, %s5809_s8  ;;  %p5817_p1 = scmp.lt.s32.totalorder %s5815_s20, %s5809_s8 }
 0x10c   : > { %p5811_p12 = pnand %p5810_p11, %p5962_p5  ;;  %p5818_p2 = por %p5817_p1, %p5816_p0 }
 0x10e   : > { %p5812_p13 = pneg %p5811_p12 }
 0x110   : > { %p5819_p3 = pnand %p5818_p2, %p5812_p13 }
 0x140   : > { %v4378_v7 = vpop.permute.xlu0 %4377 }
 0x141   : > { %5212 = vmatprep.mubr.msk.f32.mxu1 %vm3371_vm9, %v4378_v7 }
 0x148   : > { %v4380_v55 = vpop.permute.xlu1 %4379 }
 0x149   : > { %5213 = vmatmul.mubr.msk.f32.vlgmr.msra.gmra.mrb[8].mxu1 %vm3371_vm9, %v4380_v55 }
 0x16d   : > { %v4382_v31 = vpop.permute.xlu0 %4381 }
 0x16e   : > { %5215 = vmatprep.mubr.msk.f32.mxu1 %vm3371_vm9, %v4382_v31  ;;  %v4384_v3 = vpop.permute.xlu1 %4383 }
 0x16f   : > { %5216 = vmatmul.mubr.msk.f32.gmra.mrb[10].mxu1 %vm3371_vm9, %v4384_v3 }
 0x173   : > { %v4386_v44 = vpop.permute.xlu0 %4385 }
 0x174   : > { %5218 = vmatprep.mubr.msk.f32.mxu1 %vm3371_vm9, %v4386_v44 }
 0x176   : > { %v4388_v32 = vpop.permute.xlu1 %4387 }
 0x177   : > { %5219 = vmatmul.mubr.msk.f32.gmra.mrb[12].mxu1 %vm3371_vm9, %v4388_v32 }
 0x17a   : > { %v4392_v28 = vpop.permute.xlu1 %4391 }
 0x17b   : > { %v4390_v48 = vpop.permute.xlu0 %4389 }
 0x17c   : > { %5221 = vmatprep.mubr.msk.f32.mxu1 %vm3371_vm9, %v4390_v48 }
 0x17d   : > { %5222 = vmatmul.mubr.msk.f32.gmra.mrb[14].mxu1 %vm3371_vm9, %v4392_v28 }
 0x184   : > { %v5144_v38 = vpop.f32.mrb[0].mxu1 }
 0x185   : > { %v1223_v37 = vpop.f32.mrb[1].mxu1 }
 0x186   : > { %v5145_v43 = vpop.f32.mrb[2].mxu1 }
 0x187   : > { %v1226_v12 = vpop.f32.mrb[3].mxu1 }
 0x1ba   : > { %v5204_v19 = vpop.f32.mrb[0].mxu0 }
 0x1bb   : > { %v7214_v14 = vadd.f32 %v5204_v19, %v5144_v38  ;;  %v3291_v41 = vpop.f32.mrb[1].mxu0 }
 0x1bc   : > { %v7216_v29 = vadd.f32 %v3291_v41, %v1223_v37  ;;  %v5205_v33 = vpop.f32.mrb[2].mxu0 }
 0x1bd   : > { %v3340_v50 = vcombine.high %v7214_v14, %v7214_v14  ;;  %3359 = vst.msk [vmem:[%s7220_s22 + $0x10] sm:$0xf] %vm3354_vm10, %v7214_v14  ;;  %v7225_v49 = vadd.f32 %v5205_v33, %v5145_v43  ;;  %v3294_v62 = vpop.f32.mrb[3].mxu0  ;;  %v3375_v24 = vsel %vm3371_vm9, %v7214_v14, 0.0 }
 0x1be   : > { %v3338_v13 = vcombine.high %v7216_v29, %v7216_v29  ;;  %3355 = vst.msk [vmem:[%s7220_s22] sm:$0xf] %vm3354_vm10, %v7216_v29  ;;  %v3372_v56 = vsel %vm3371_vm9, %v7216_v29, 0.0  ;;  %v7234_v51 = vadd.f32 %v3294_v62, %v1226_v12 }
 0x1bf   : > { %3360 = vst.msk [vmem:[%s7220_s22 + $0x14] sm:$0xf] %vm3354_vm10, %v3340_v50  ;;  %v3341_v52 = vcombine.high %v7225_v49, %v7225_v49  ;;  %3361 = vst.msk [vmem:[%s7220_s22 + $0x18] sm:$0xf] %vm3354_vm10, %v7225_v49  ;;  %v3377_v18 = vsel %vm3371_vm9, %v7225_v49, 0.0 }
 0x1c0   : > { %3356 = vst.msk [vmem:[%s7220_s22 + $0x4] sm:$0xf] %vm3354_vm10, %v3338_v13  ;;  %v3339_v27 = vcombine.high %v7234_v51, %v7234_v51  ;;  %3357 = vst.msk [vmem:[%s7220_s22 + $0x8] sm:$0xf] %vm3354_vm10, %v7234_v51  ;;  %v3373_v58 = vsel %vm3371_vm9, %v7234_v51, 0.0 }
 0x1c1   : > { %3362 = vst.msk [vmem:[%s7220_s22 + $0x1c] sm:$0xf] %vm3354_vm10, %v3341_v52  ;;  %v3374_v39 = vadd.f32 %v3373_v58, %v3372_v56 }
 0x1c2   : > { %3358 = vst.msk [vmem:[%s7220_s22 + $0xc] sm:$0xf] %vm3354_vm10, %v3339_v27 }
 0x1c3   : > { %v3376_v0 = vadd.f32 %v3375_v24, %v3374_v39 }
 0x1c5   : > { %v3378_v4 = vadd.f32 %v3377_v18, %v3376_v0 }
 0x1c7   : > { %v5160_v36 = vpop.f32.mrb[4].mxu1 }
 0x1c8   : > { %v1793_v15 = vpop.f32.mrb[5].mxu1 }
 0x1c9   : > { %v5161_v60 = vpop.f32.mrb[6].mxu1 }
 0x1ca   : > { %v1796_v54 = vpop.f32.mrb[7].mxu1 }
 0x1d3   : > { %v5208_v17 = vpop.f32.mrb[4].mxu0 }
 0x1d4   : > { %v7260_v10 = vadd.f32 %v5208_v17, %v5160_v36  ;;  %v3307_v20 = vpop.f32.mrb[5].mxu0 }
 0x1d5   : > { %v7262_v30 = vadd.f32 %v3307_v20, %v1793_v15  ;;  %v5209_v11 = vpop.f32.mrb[6].mxu0 }
 0x1d6   : > { %v3344_v9 = vcombine.high %v7260_v10, %v7260_v10  ;;  %3367 = vst.msk [vmem:[%s7220_s22 + $0x30] sm:$0xf] %vm3354_vm10, %v7260_v10  ;;  %v7269_v59 = vadd.f32 %v5209_v11, %v5161_v60  ;;  %v3310_v26 = vpop.f32.mrb[7].mxu0  ;;  %v3383_v61 = vsel %vm3371_vm9, %v7260_v10, 0.0 }
 0x1d7   : > { %v3342_v5 = vcombine.high %v7262_v30, %v7262_v30  ;;  %3363 = vst.msk [vmem:[%s7220_s22 + $0x20] sm:$0xf] %vm3354_vm10, %v7262_v30  ;;  %v3379_v34 = vsel %vm3371_vm9, %v7262_v30, 0.0  ;;  %v7278_v47 = vadd.f32 %v3310_v26, %v1796_v54 }
 0x1d8   : > { %3368 = vst.msk [vmem:[%s7220_s22 + $0x34] sm:$0xf] %vm3354_vm10, %v3344_v9  ;;  %v3380_v22 = vadd.f32 %v3379_v34, %v3378_v4  ;;  %v3345_v63 = vcombine.high %v7269_v59, %v7269_v59  ;;  %3369 = vst.msk [vmem:[%s7220_s22 + $0x38] sm:$0xf] %vm3354_vm10, %v7269_v59  ;;  %v3385_v35 = vsel %vm3371_vm9, %v7269_v59, 0.0 }
 0x1d9   : > { %3364 = vst.msk [vmem:[%s7220_s22 + $0x24] sm:$0xf] %vm3354_vm10, %v3342_v5  ;;  %v3343_v25 = vcombine.high %v7278_v47, %v7278_v47  ;;  %3365 = vst.msk [vmem:[%s7220_s22 + $0x28] sm:$0xf] %vm3354_vm10, %v7278_v47  ;;  %v3381_v45 = vsel %vm3371_vm9, %v7278_v47, 0.0 }
 0x1da   : > { %3370 = vst.msk [vmem:[%s7220_s22 + $0x3c] sm:$0xf] %vm3354_vm10, %v3345_v63  ;;  %v3382_v46 = vadd.f32 %v3381_v45, %v3380_v22 }
 0x1db   : > { %3366 = vst.msk [vmem:[%s7220_s22 + $0x2c] sm:$0xf] %vm3354_vm10, %v3343_v25 }
 0x1dc   : > { %v3384_v53 = vadd.f32 %v3383_v61, %v3382_v46 }
 0x1dd   : > { %5822 = shalt.err (!%p5819_p3)
}
 0x1de   : > { %s5823_s18 = scalar_lea.hbm %s7309_s19, 1024  ;;  %s5827_s16 = scalar_lea.hbm %s7405_s4, 2048 }
 0x1df   : > { %p5824_p4 = scmp.ne.s32.totalorder %s7309_s19, %s5823_s18  ;;  %p5828_p9 = scmp.lt.u32.totalorder %s7309_s19, %s7405_s4 }
 0x1e0   : > { %p5829_p10 = scmp.lt.u32.totalorder %s5827_s16, %s5823_s18  ;;  %p5831_p12 = scmp.lt.u32.totalorder %s5823_s18, %s7309_s19 }
 0x1e1   : > { %p5825_p7 = pnand %p5824_p4, %p5962_p5 }
 0x1e2   : > { %p5830_p11 = por %p5829_p10, %p5828_p9 }
 0x1e3   : > { %p5826_p8 = pneg %p5825_p7 }
 0x1e4   : > { %p5832_p13 = por %p5831_p12, %p5830_p11 }
 0x1e6   : > { %p5833_p0 = pnand %p5832_p13, %p5826_p8 }
 0x1e8   : > { %5836 = shalt.err (!%p5833_p0)
}
 0x1e9   : > { %s5883_s8 = smov 64   ;;  %v3386_v57 = vadd.f32 %v3385_v35, %v3384_v53  ;;  %s4707_s9 = sshll.u32 %s5977_s15, 3  ;;  %v5041_v17 = vld [vmem:[%s7404_s3] ss:$0 sm:$0xff]  ;;  %vm4518_vm11 = vcmask 64512  }
 0x1ea   : > { %5285 = dma.vmem_to_hbm [thread:$0]  (%p5962_p5), %s7311_s14, 1024, %s7309_s19, %s7315_s29, %s5883_s8, %s5883_s8, %s5875_s23  }
 0x1eb   : > { %v3387_v1 = vrot.slane %v3386_v57, 4  ;;  %s306_s11 = scalar_lea.vmem %s7407_s6, %s4707_s9  ;;  %s4705_s23 = sshll.u32 %s5945_s28, 3 }
 0x1ec   : > { %s310_s29 = scalar_lea.vmem %s7408_s7, %s4707_s9  ;;  %p298_p5 = scmp.lt.s32.totalorder %s4705_s23, 15 }
 0x1ed   : > { %v3388_v42 = vadd.f32 %v3387_v1, %v3386_v57 }
 0x1ee   : > { %s7477_s23 = smov (!%p298_p5, %s4705_s23), 15 }
 0x1ef   : > { %v3389_v6 = vrot.slane %v3388_v42, 2  ;;  %s4706_s22 = sshll.u32 %s7477_s23, 3 }
 0x1f0   : > { %s301_s28 = scalar_lea.vmem %s7406_s5, %s4706_s22 }
 0x1f1   : > { %v3390_v40 = vadd.f32 %v3389_v6, %v3388_v42 }
 0x1f3   : > { %v3391_v21 = vrot.slane %v3390_v40, 1 }
 0x1f5   : > { %v3392_v16 = vadd.f32 %v3391_v21, %v3390_v40 }
 0x1f7   : > { %v3393_v8 = vmul.f32 0.015625, %v3392_v16 }
 0x1f9   : > { %v3394_v23 = vsub.f32 %v7216_v29, %v3393_v8  ;;  %v3395_v2 = vsub.f32 %v7234_v51, %v3393_v8  ;;  %v3396_v7 = vsub.f32 %v7214_v14, %v3393_v8  ;;  %v3397_v55 = vsub.f32 %v7225_v49, %v3393_v8  ;;  %3431 = vst.msk [vmem:[%s306_s11] sm:$0xff] %vm3371_vm9, %v3393_v8 }
 0x1fa   : > { %v3398_v31 = vsub.f32 %v7262_v30, %v3393_v8  ;;  %v3399_v3 = vsub.f32 %v7278_v47, %v3393_v8  ;;  %v3400_v44 = vsub.f32 %v7260_v10, %v3393_v8  ;;  %v3401_v32 = vsub.f32 %v7269_v59, %v3393_v8 }
 0x1fb   : > { %v3402_v48 = vmul.f32 %v3394_v23, %v3394_v23  ;;  %v3403_v28 = vmul.f32 %v3395_v2, %v3395_v2  ;;  %v3404_v38 = vmul.f32 %v3396_v7, %v3396_v7  ;;  %v3405_v37 = vmul.f32 %v3397_v55, %v3397_v55 }
 0x1fc   : > { %v3406_v43 = vmul.f32 %v3398_v31, %v3398_v31  ;;  %v3407_v29 = vmul.f32 %v3399_v3, %v3399_v3  ;;  %v3408_v49 = vmul.f32 %v3400_v44, %v3400_v44  ;;  %v3409_v56 = vmul.f32 %v3401_v32, %v3401_v32 }
 0x1fd   : > { %v3410_v12 = vsel %vm3371_vm9, %v3402_v48, 0.0  ;;  %v3411_v19 = vsel %vm3371_vm9, %v3403_v28, 0.0  ;;  %v3413_v14 = vsel %vm3371_vm9, %v3404_v38, 0.0  ;;  %v3415_v33 = vsel %vm3371_vm9, %v3405_v37, 0.0 }
 0x1fe   : > { %v3412_v41 = vadd.f32 %v3411_v19, %v3410_v12  ;;  %v3417_v62 = vsel %vm3371_vm9, %v3406_v43, 0.0  ;;  %v3419_v51 = vsel %vm3371_vm9, %v3407_v29, 0.0  ;;  %v3421_v24 = vsel %vm3371_vm9, %v3408_v49, 0.0 }
 0x1ff   : > { %v3423_v58 = vsel %vm3371_vm9, %v3409_v56, 0.0 }
 0x200   : > { %v3414_v50 = vadd.f32 %v3413_v14, %v3412_v41 }
 0x202   : > { %v3416_v13 = vadd.f32 %v3415_v33, %v3414_v50 }
 0x204   : > { %v3418_v52 = vadd.f32 %v3417_v62, %v3416_v13 }
 0x206   : > { %v3420_v27 = vadd.f32 %v3419_v51, %v3418_v52 }
 0x208   : > { %v3422_v39 = vadd.f32 %v3421_v24, %v3420_v27 }
 0x20a   : > { %v3424_v18 = vadd.f32 %v3423_v58, %v3422_v39 }
 0x20c   : > { %v3425_v0 = vrot.slane %v3424_v18, 4 }
 0x20e   : > { %v3426_v4 = vadd.f32 %v3425_v0, %v3424_v18 }
 0x210   : > { %v3427_v36 = vrot.slane %v3426_v4, 2 }
 0x212   : > { %v3428_v15 = vadd.f32 %v3427_v36, %v3426_v4 }
 0x214   : > { %v3429_v60 = vrot.slane %v3428_v15, 1 }
 0x216   : > { %v3430_v54 = vadd.f32 %v3429_v60, %v3428_v15 }
 0x218   : > { %3432 = vst.msk [vmem:[%s310_s29] sm:$0xff] %vm3371_vm9, %v3430_v54 }
 0x21c   : > { %v5214_v10 = vpop.f32.mrb[8].mxu1 }
 0x21d   : > { %v4485_v20 = vadd.f32 %v5214_v10, %v5041_v17  ;;  %v4479_v30 = vpop.f32.mrb[9].mxu1 }
 0x21e   : > { %v4480_v11 = vadd.f32 %v5041_v17, %v4479_v30 }
 0x21f   : > { %4520 = vst.msk [vmem:[%s301_s28 + $0x8] sm:$0xff] %vm4518_vm11, %v4485_v20 }
 0x220   : > { %4519 = vst.msk [vmem:[%s301_s28] sm:$0xff] %vm4518_vm11, %v4480_v11 }
 0x242   : > { %v5217_v9 = vpop.f32.mrb[10].mxu1 }
 0x243   : > { %v4495_v59 = vadd.f32 %v5217_v9, %v5041_v17  ;;  %v4489_v26 = vpop.f32.mrb[11].mxu1 }
 0x244   : > { %v4490_v5 = vadd.f32 %v5041_v17, %v4489_v26 }
 0x245   : > { %4522 = vst.msk [vmem:[%s301_s28 + $0x18] sm:$0xff] %vm4518_vm11, %v4495_v59 }
 0x246   : > { %4521 = vst.msk [vmem:[%s301_s28 + $0x10] sm:$0xff] %vm4518_vm11, %v4490_v5 }
 0x24a   : > { %v5220_v34 = vpop.f32.mrb[12].mxu1 }
 0x24b   : > { %v4505_v47 = vadd.f32 %v5220_v34, %v5041_v17  ;;  %v4499_v22 = vpop.f32.mrb[13].mxu1 }
 0x24c   : > { %v4500_v63 = vadd.f32 %v5041_v17, %v4499_v22 }
 0x24d   : > { %4524 = vst.msk [vmem:[%s301_s28 + $0x28] sm:$0xff] %vm4518_vm11, %v4505_v47 }
 0x24e   : > { %4523 = vst.msk [vmem:[%s301_s28 + $0x20] sm:$0xff] %vm4518_vm11, %v4500_v63 }
 0x250   : > { %v5223_v61 = vpop.f32.mrb[14].mxu1 }
 0x251   : > { %v4515_v25 = vadd.f32 %v5223_v61, %v5041_v17  ;;  %v4509_v45 = vpop.f32.mrb[15].mxu1 }
 0x252   : > { %v4510_v46 = vadd.f32 %v5041_v17, %v4509_v45 }
 0x253   : > { %4526 = vst.msk [vmem:[%s301_s28 + $0x38] sm:$0xff] %vm4518_vm11, %v4515_v25 }
 0x254   : > { %4525 = vst.msk [vmem:[%s301_s28 + $0x30] sm:$0xff] %vm4518_vm11, %v4510_v46 }
 0x255 PF: > { %p5291_p1 = scmp.ge.s32.totalorder %s5871_s27, 2  ;;  %s4579_s15 = sand.u32 1, %s5859_s24  }
 0x256   : > { %s4580_s8 = scalar_lea.sflag [#allocation3], %s4579_s15 }
 0x257   : > { %p5288_p2 = pnand %p5291_p1, %p5966_p6 }
 0x259   : > { %5854 = dma.done.wait (!%p5288_p2), %s4580_s8, 1024  }
 0x25a   : > { %5856 = vsyncadd (!%p5288_p2), %s4580_s8, 4294966272  ;;  %p18_p3 = scmp.ge.s32.totalorder %s5949_s30, 4   ;;  %s7472_s24 = smov %s5863_s25 }
 0x25b   : > { %s7473_s25 = smov %s5867_s26  ;;  %s7474_s26 = smov %s5960_s10 }
 0x25c   : > { %s7475_s27 = smov %s5949_s30  ;;  %20 = sbr.rel (!%p18_p3) target bundleno = 3 (0x3), region = 117 }
 0x263   :  { %4607 = vsyncpa [#allocation3], 1 }
 0x264   :  { %4609 = vsyncpa [#allocation3 + $0x1], 1 }

</bundles_post_ra>
